<compile_context>
chip_gen: v6e
topology: v6e:2x2x1
jax: 0.10.0
libtpu: 0.0.40
codegen_flags: <defaults>
</compile_context>

<pallas_src>
from functools import partial

import jax
import jax.numpy as jnp
from jax import lax
from jax.experimental import pallas as pl
from jax.experimental.pallas import tpu as pltpu


_PAD_SENTINEL = 1.0e30   # sq_j value for zero-padded columns -> exp(...) == 0


def _round_up(v, m):
    return ((v + m - 1) // m) * m


def _vmem_capacity_bytes():
    """Best-effort query of per-core VMEM; conservative fallback (v7x = 64 MiB)."""
    try:
        cap = int(getattr(pltpu.get_tpu_info(), "vmem_capacity_bytes"))
        if cap > 0:
            return cap
    except Exception:
        pass
    return 64 * 1024 * 1024


def _pick_tiling(hw, hw_cols_pad, c_pad, in_bytes, out_bytes):
    """Choose the output row-tile TM and padded row extent from the VMEM budget."""
    vmem_cap = _vmem_capacity_bytes()
    budget = int(0.70 * vmem_cap)
    # TM-independent buffers (double-buffered by the pipeline): cols + sq.
    resident = 2 * c_pad * hw_cols_pad * in_bytes + 2 * 8 * hw_cols_pad * 4
    # Per output-row bytes: out double-buffer + rows double-buffer + f32 temps.
    per_row = (2 * hw_cols_pad * out_bytes
               + 2 * c_pad * in_bytes
               + 3 * hw_cols_pad * 4)
    tm_budget = max(128, ((budget - resident) // per_row // 128) * 128)

    tm = min(tm_budget, _round_up(hw, 128))
    hw_rows_pad = _round_up(hw, tm)        # rows input padded so every block is in-bounds
    return tm, hw_rows_pad, vmem_cap


def _norm_simi_kernel(rows_ref, cols_ref, sq_ref, o_ref):
    rows = rows_ref[0]                                     # (TM, C_pad)
    cols = cols_ref[0]                                     # (C_pad, HWc_pad), VMEM-resident
    sq_j = sq_ref[0]                                       # (1, HWc_pad) f32, pad = +1e30

    # Gram on the MXU: (TM, C_pad) @ (C_pad, HWc_pad) -> f32 accumulate.
    gram = jnp.dot(rows, cols, preferred_element_type=jnp.float32)

    # Softmax-equivalent logits: s = 2*g_ij - sq_j = -d2_ij + sq_i; the sq_i
    # shift cancels in the row normalization (handled by the max subtraction).
    # Padded columns carry sq_j = +1e30 -> exp(...) underflows to exactly 0.
    s = 2.0 * gram - sq_j
    m = jnp.max(s, axis=-1, keepdims=True)
    p = jnp.exp(s - m)
    denom = jnp.sum(p, axis=-1, keepdims=True)
    inv = pl.reciprocal(denom, approx=True)                # EUP vrcp
    inv = inv * (2.0 - denom * inv)                        # one Newton step -> ~f32 exact
    o_ref[0] = (p * inv).astype(o_ref.dtype)


def comp_norm_simi_matrix_batch(x_nchw, *, mxu_dtype=jnp.float32,
                                out_dtype=jnp.float32):
    """x_nchw: (N, C, H, W) -> (N, H*W, H*W) row-normalized Gaussian affinity."""
    N, C, H, W = x_nchw.shape
    HW = H * W
    x = x_nchw.astype(jnp.float32).reshape(N, C, HW)       # channel-major features

    in_bytes = jnp.dtype(mxu_dtype).itemsize
    out_bytes = jnp.dtype(out_dtype).itemsize
    sub_mult = max(8, 32 // in_bytes)                      # 8 for f32, 16 for bf16
    c_pad = _round_up(C, sub_mult)
    hw_cols_pad = _round_up(HW, 128)                       # lane-dense logits / stores

    tm, hw_rows_pad, vmem_cap = _pick_tiling(HW, hw_cols_pad, c_pad,
                                             in_bytes, out_bytes)

    # rhs "columns" operand: (N, C_pad, HWc_pad) -- straight from NCHW, no transpose.
    cols = jnp.pad(x, ((0, 0), (0, c_pad - C), (0, hw_cols_pad - HW))).astype(mxu_dtype)
    # lhs "rows" operand: (N, HWr_pad, C_pad) -- one wrapper-level transpose only.
    rows = jnp.pad(jnp.transpose(x, (0, 2, 1)),
                   ((0, 0), (0, hw_rows_pad - HW), (0, c_pad - C))).astype(mxu_dtype)
    # Precomputed column squared norms, f32: (N, 1, HWc_pad); padded cols = +1e30
    # so they contribute exactly 0 to every row sum (mask folded into the data).
    sq = jnp.pad(jnp.sum(x * x, axis=1, keepdims=True),
                 ((0, 0), (0, 0), (0, hw_cols_pad - HW)),
                 constant_values=_PAD_SENTINEL)

    grid = (N, hw_rows_pad // tm)

    # Advisory VMEM ceiling: enough for our buffers, capped below physical VMEM.
    est_vmem = (2 * tm * c_pad * in_bytes                  # rows double-buffer
                + 2 * c_pad * hw_cols_pad * in_bytes       # resident cols (x2 buf)
                + 2 * 8 * hw_cols_pad * 4                  # sq (sublane padded)
                + 2 * tm * hw_cols_pad * out_bytes         # out double-buffer
                + 3 * tm * hw_cols_pad * 4)                # f32 temporaries
    vmem_limit = int(min(0.92 * vmem_cap, est_vmem + (16 << 20)))
    vmem_limit = max(vmem_limit, 32 << 20)

    cost = pl.CostEstimate(
        flops=2 * N * hw_rows_pad * hw_cols_pad * c_pad
              + 6 * N * hw_rows_pad * hw_cols_pad,
        transcendentals=N * hw_rows_pad * hw_cols_pad,
        bytes_accessed=rows.size * in_bytes + cols.size * in_bytes
                       + sq.size * 4 + N * HW * HW * out_bytes,
    )

    # Exact output shape: boundary blocks are masked on writeback by Mosaic, so
    # no padded intermediate + XLA slice copy is ever materialized in HBM.
    out = pl.pallas_call(
        _norm_simi_kernel,
        out_shape=jax.ShapeDtypeStruct((N, HW, HW), out_dtype),
        grid=grid,
        in_specs=[
            pl.BlockSpec((1, tm, c_pad), lambda b, i: (b, i, 0)),            # row tile
            pl.BlockSpec((1, c_pad, hw_cols_pad), lambda b, i: (b, 0, 0)),   # resident cols
            pl.BlockSpec((1, 1, hw_cols_pad), lambda b, i: (b, 0, 0)),       # sq_j
        ],
        out_specs=pl.BlockSpec((1, tm, hw_cols_pad), lambda b, i: (b, i, 0)),
        compiler_params=pltpu.CompilerParams(
            dimension_semantics=("parallel", "parallel"),
            vmem_limit_bytes=vmem_limit),
        cost_estimate=cost,
    )(rows, cols, sq)

    return out


def _reference(x_nchw):
    N, C, H, W = x_nchw.shape
    HW = H * W
    f = jnp.transpose(x_nchw.astype(jnp.float32).reshape(N, C, HW), (0, 2, 1))
    d2 = jnp.sum((f[:, :, None, :] - f[:, None, :, :]) ** 2, axis=-1)
    w = jnp.exp(-d2)
    return w / jnp.sum(w, axis=-1, keepdims=True)


if __name__ == "__main__":
    key0, key1 = jax.random.split(jax.random.PRNGKey(0))

    # --- primary test: small DeepLab-ish shapes, f32 MXU path ----------------
    N, C, H, W = 2, 4, 16, 16                      # HW = 256 (lane-aligned)
    x = jax.random.normal(key0, (N, C, H, W), dtype=jnp.float32)
    out = jax.block_until_ready(comp_norm_simi_matrix_batch(x))
    ref = _reference(x)
    assert out.shape == (N, H * W, H * W)
    assert jnp.allclose(out, ref, rtol=1e-3, atol=1e-5), "f32 path mismatch vs reference"
    assert jnp.allclose(jnp.sum(out, axis=-1), 1.0, atol=1e-3)

    # --- padded / masked path: HW and C not multiples of 128 -----------------
    N2, C2, H2, W2 = 1, 3, 10, 9                   # HW = 90 -> boundary-masked output
    x2 = jax.random.normal(key1, (N2, C2, H2, W2), dtype=jnp.float32)
    out2 = jax.block_until_ready(comp_norm_simi_matrix_batch(x2))
    ref2 = _reference(x2)
    assert out2.shape == (N2, H2 * W2, H2 * W2)
    assert jnp.allclose(out2, ref2, rtol=1e-3, atol=1e-5), "padded path mismatch vs reference"
    assert jnp.allclose(jnp.sum(out2, axis=-1), 1.0, atol=1e-3)

    # --- bf16 MXU-input path (perf option; looser numerics) ------------------
    out_bf = jax.block_until_ready(
        comp_norm_simi_matrix_batch(x, mxu_dtype=jnp.bfloat16))
    assert out_bf.shape == (N, H * W, H * W)
    assert bool(jnp.all(jnp.isfinite(out_bf)))
    assert jnp.allclose(jnp.sum(out_bf, axis=-1), 1.0, atol=1e-2)
    assert float(jnp.max(jnp.abs(out_bf - ref))) < 0.1

    print("KERNEL_OK")
</pallas_src>

<mosaic_0001>
module attributes {stable_mosaic.version = 11 : i64} {
  func.func @_norm_simi_kernel(%arg0: i32, %arg1: i32, %arg2: memref<1x256x8xf32, #tpu.memory_space<vmem>>, %arg3: memref<1x8x256xf32, #tpu.memory_space<vmem>>, %arg4: memref<1x1x256xf32, #tpu.memory_space<vmem>>, %arg5: memref<1x256x256xf32, #tpu.memory_space<vmem>>) attributes {dimension_semantics = [#tpu.dimension_semantics<parallel>, #tpu.dimension_semantics<parallel>], iteration_bounds = array<i64: 2, 1>, scalar_prefetch = 0 : i64, scratch_operands = 0 : i64, tpu.core_type = #tpu.core_type<tc>, window_params = [{transform_indices = @transform_0, window_bounds = array<i64: 1, 256, 8>}, {transform_indices = @transform_1, window_bounds = array<i64: 1, 8, 256>}, {transform_indices = @transform_2, window_bounds = array<i64: 1, 1, 256>}, {transform_indices = @transform_3, window_bounds = array<i64: 1, 256, 256>}]} {
    %c0 = arith.constant 0 : index
    %c0_0 = arith.constant 0 : index
    %c0_1 = arith.constant 0 : index
    %0 = vector.load %arg2[%c0, %c0_0, %c0_1] : memref<1x256x8xf32, #tpu.memory_space<vmem>>, vector<1x256x8xf32>
    %1 = vector.shape_cast %0 : vector<1x256x8xf32> to vector<256x8xf32>
    %c0_2 = arith.constant 0 : index
    %c0_3 = arith.constant 0 : index
    %c0_4 = arith.constant 0 : index
    %2 = vector.load %arg3[%c0_2, %c0_3, %c0_4] : memref<1x8x256xf32, #tpu.memory_space<vmem>>, vector<1x8x256xf32>
    %3 = vector.shape_cast %2 : vector<1x8x256xf32> to vector<8x256xf32>
    %c0_5 = arith.constant 0 : index
    %c0_6 = arith.constant 0 : index
    %c0_7 = arith.constant 0 : index
    %4 = vector.load %arg4[%c0_5, %c0_6, %c0_7] : memref<1x1x256xf32, #tpu.memory_space<vmem>>, vector<1x1x256xf32>
    %5 = vector.shape_cast %4 : vector<1x1x256xf32> to vector<1x256xf32>
    %cst = arith.constant dense<0.000000e+00> : vector<256x256xf32>
    %6 = tpu.matmul %1, %3, %cst {dimension_numbers = #tpu.dot_dimension_numbers<[1], [0], [0], [1], [0, 0, 1, 1], [], []>} : vector<256x8xf32>, vector<8x256xf32>, vector<256x256xf32> -> vector<256x256xf32>
    %cst_8 = arith.constant 2.000000e+00 : f32
    %7 = vector.broadcast %cst_8 : f32 to vector<256x256xf32>
    %8 = arith.mulf %7, %6 : vector<256x256xf32>
    %9 = vector.broadcast %5 : vector<1x256xf32> to vector<256x256xf32>
    %10 = arith.subf %8, %9 : vector<256x256xf32>
    %cst_9 = arith.constant dense<0xFF800000> : vector<256xf32>
    %11 = vector.multi_reduction <maximumf>, %10, %cst_9 [1] : vector<256x256xf32> to vector<256xf32>
    %12 = vector.shape_cast %11 : vector<256xf32> to vector<256x1xf32>
    %13 = vector.broadcast %12 : vector<256x1xf32> to vector<256x256xf32>
    %14 = arith.subf %10, %13 : vector<256x256xf32>
    %15 = math.exp %14 : vector<256x256xf32>
    %cst_10 = arith.constant dense<0.000000e+00> : vector<256xf32>
    %16 = vector.multi_reduction <add>, %15, %cst_10 [1] : vector<256x256xf32> to vector<256xf32>
    %17 = vector.shape_cast %16 : vector<256xf32> to vector<256x1xf32>
    %18 = tpu.reciprocal %17 {approx = true} : vector<256x1xf32> -> vector<256x1xf32>
    %19 = arith.mulf %17, %18 : vector<256x1xf32>
    %cst_11 = arith.constant 2.000000e+00 : f32
    %20 = vector.broadcast %cst_11 : f32 to vector<256x1xf32>
    %21 = arith.subf %20, %19 : vector<256x1xf32>
    %22 = arith.mulf %18, %21 : vector<256x1xf32>
    %23 = vector.broadcast %22 : vector<256x1xf32> to vector<256x256xf32>
    %24 = arith.mulf %15, %23 : vector<256x256xf32>
    %c0_12 = arith.constant 0 : index
    %c0_13 = arith.constant 0 : index
    %c0_14 = arith.constant 0 : index
    %25 = vector.load %arg5[%c0_12, %c0_13, %c0_14] : memref<1x256x256xf32, #tpu.memory_space<vmem>>, vector<1x256x256xf32>
    %26 = vector.shape_cast %25 : vector<1x256x256xf32> to vector<256x256xf32>
    %27 = vector.shape_cast %24 : vector<256x256xf32> to vector<1x256x256xf32>
    tpu.vector_store %arg5[%c0_12, %c0_13, %c0_14], %27 {strides = array<i32>} : memref<1x256x256xf32, #tpu.memory_space<vmem>>, vector<1x256x256xf32>,
    return
  }
  func.func @transform_0(%arg0: i32, %arg1: i32) -> (i32, i32, i32) {
    %c0_i32 = arith.constant 0 : i32
    %c0_i32_0 = arith.constant 0 : i32
    return %arg0, %arg1, %c0_i32 : i32, i32, i32
  }
  func.func @transform_1(%arg0: i32, %arg1: i32) -> (i32, i32, i32) {
    %c0_i32 = arith.constant 0 : i32
    %c0_i32_0 = arith.constant 0 : i32
    %c0_i32_1 = arith.constant 0 : i32
    return %arg0, %c0_i32, %c0_i32_0 : i32, i32, i32
  }
  func.func @transform_2(%arg0: i32, %arg1: i32) -> (i32, i32, i32) {
    %c0_i32 = arith.constant 0 : i32
    %c0_i32_0 = arith.constant 0 : i32
    %c0_i32_1 = arith.constant 0 : i32
    return %arg0, %c0_i32, %c0_i32_0 : i32, i32, i32
  }
  func.func @transform_3(%arg0: i32, %arg1: i32) -> (i32, i32, i32) {
    %c0_i32 = arith.constant 0 : i32
    %c0_i32_0 = arith.constant 0 : i32
    return %arg0, %arg1, %c0_i32 : i32, i32, i32
  }
}

</mosaic_0001>

<bundles_post_ra>
// kernel: tpu_custom_call.1
= control target key start
LH: loop header
LB: loop body
LE: loop exit
PB: predicated region body
PF: predicated region fallthrough
CT: control target
= control target key end

     0   :  { %8 = vsyncpa [#allocation3], 0  ;;  %s2896_s0 = inlined_call_operand.vmem [shape: f32[2,256,8], index: 0, kind: input, shape index: {}]   ;;  %s2897_s1 = inlined_call_operand.vmem [shape: f32[2,8,256], index: 1, kind: input, shape index: {}]   ;;  %s2898_s2 = inlined_call_operand.vmem [shape: f32[2,1,256], index: 2, kind: input, shape index: {}]   ;;  %s2899_s3 = inlined_call_operand.hbm [shape: f32[2,256,256], index: 3, kind: output, shape index: {}]  }
   0x1   :  { %10 = vsyncpa [#allocation3 + $0x1], 0  ;;  %s1930_s12 = smov 0   ;;  %s1932_s13 = smov 0  }
   0x2   :  { %s1934_s14 = smov 0   ;;  %s1936_s15 = smov 0  }
   0x3   :  { %s1938_s16 = smov 0   ;;  %s1940_s17 = smov 0  }
   0x4 LB: > { %s1525_s18 = sadd.s32 4294967295, %s1904_s17   ;;  %s1526_s19 = sadd.s32 4294967294, %s1904_s17   ;;  %s1904_s17 = sphi %s1940_s17, %s16_s17   ;;  %s1900_s16 = sphi %s1938_s16, %s3017_s16   ;;  %s1896_s15 = sphi %s1936_s15, %s3016_s15   ;;  %s1892_s14 = sphi %s1934_s14, %s3015_s14   ;;  %s1888_s13 = sphi %s1932_s13, %s3014_s13   ;;  %s1884_s12 = sphi %s1930_s12, %s3013_s12  }
   0x5   : > { %s28_s20 = sadd.s32 1, %s1900_s16  ;;  %s117_s21 = sadd.s32 1, %s1892_s14 }
   0x6   : > { %p30_p0 = scmp.ge.s32.totalorder %s28_s20, 2  ;;  %p127_p1 = scmp.ne.s32.totalorder %s1892_s14, %s1888_s13 }
   0x7   : > { %p128_p2 = scmp.eq.s32.totalorder %s1525_s18, 1  ;;  %p133_p3 = scmp.ne.s32.totalorder %s1888_s13, %s1884_s12 }
   0x8   : > { %s3019_s20 = smov (%p30_p0, %s28_s20), 0  ;;  %p134_p5 = scmp.eq.s32.totalorder %s1526_s19, 1 }
   0x9   : > { %p1970_p4 = por %p128_p2, %p127_p1  ;;  %s112_s23 = ssub.s32 %s1900_s16, %s3019_s20 }
   0xa   : > { %p1529_p6 = scmp.ge.s32.totalorder %s1904_s17, 1  ;;  %p115_p7 = scmp.eq.s32.totalorder %s112_s23, 0 }
   0xb   : > { %p1977_p8 = por %p134_p5, %p133_p3  ;;  %p180_p9 = scmp.lt.s32.totalorder %s1904_s17, 3 }
   0xc   : > { %s1983_s25 = scalar_select %p115_p7, %s1892_s14, %s117_s21  }
   0xd   : > { %p181_p10 = pnand %p1529_p6, %p180_p9 }
   0xf   : > { %184 = sbr.rel (%p181_p10) target bundleno = 631 (0x277), region = 32 }
  0x14   : > { %p218_p11 = scmp.lt.s32.totalorder %s1896_s15, 1  ;;  %v1906_v0 = vmov 0.0   ;;  %vm272_vm0 = vcmask 64512   ;;  %v691_v35 = vlaneseq  ;;  %s214_s18 = sand.u32 1, %s1888_s13  }
  0x15   : > { %433 = vmatprep.mubr.f32.mxu0 %v1906_v0  ;;  %529 = vmatprep.mubr.f32.mxu1 %v1906_v0  ;;  %s1530_s19 = sshll.u32 %s214_s18, 9  ;;  %s1575_s23 = sshll.u32 %s1896_s15, 13 }
  0x16   : > { %s1989_s26 = scalar_select %p218_p11, %s1896_s15, 1  ;;  %v692_v36 = vshrl.u32 %v691_v35, 7 }
  0x17   : > { %s2625_s21 = scalar_lea.vmem [#allocation2], %s1530_s19  ;;  %s2841_s29 = scalar_lea.hbm %s2899_s3, %s1575_s23 }
  0x18   : > { %s1573_s27 = sshll.u32 %s1989_s26, 8  ;;  %s1574_s28 = sshll.u32 %s1989_s26, 4  ;;  %v693_v37 = vsub.s32 0, %v692_v36  ;;  %v697_v38 = vsub.s32 1, %v692_v36 }
  0x19   : > { %s1996_s4 = scalar_lea.vmem %s2896_s0, %s1573_s27  ;;  %s231_s7 = scalar_lea.vmem %s2897_s1, %s1574_s28 }
  0x1a   : > { %v270_v1 = vld [vmem:[%s231_s7 + $0x8] sm:$0xff]  ;;  %v269_v2 = vld [vmem:[%s231_s7] sm:$0xff]  ;;  %v239_v7 = vld [vmem:[%s1996_s4 + $0x10] sm:$0xff]  ;;  %s1535_s8 = sshll.u32 %s1989_s26, 1  ;;  %s1422_s26 = sshll.u32 %s2625_s21, 4  ;;  %s2843_s26 = int_to_ptr.vmem [resolvable:$true] %s1422_s26 }
  0x1b   : > { %v237_v3 = vld [vmem:[%s1996_s4] sm:$0xff]  ;;  %399 = vmatprep.subr.mxu0 %v270_v1  ;;  %1576 = vmatprep.subr.mxu1 %v270_v1  ;;  %v238_v5 = vld [vmem:[%s1996_s4 + $0x8] sm:$0xff]  ;;  %v255_v8 = vld [vmem:[%s1996_s4 + $0x90] sm:$0xff]  ;;  %s235_s11 = scalar_lea.vmem %s2898_s2, %s1535_s8  ;;  %s2851_s15 = scalar_lea.sflag [#allocation3], %s214_s18 }
  0x1c   : > { %v253_v4 = vld [vmem:[%s1996_s4 + $0x80] sm:$0xff]  ;;  %400 = vmatpush1.msra.mxu0 %v269_v2  ;;  %1577 = vmatpush1.msra.mxu1 %v269_v2  ;;  %v254_v6 = vld [vmem:[%s1996_s4 + $0x88] sm:$0xff]  ;;  %v240_v9 = vld [vmem:[%s1996_s4 + $0x18] sm:$0xff]  ;;  %s1828_s30 = scalar_lea.vmem %s2843_s26, 8192 }
  0x1d   : > { %1536 = vmatmul.mubr.msk.f32.vlgmr.msra.gmra.mxu0 %vm272_vm0, %v237_v3  ;;  %1552 = vmatmul.mubr.msk.f32.vlgmr.msra.gmra.mxu1 %vm272_vm0, %v253_v4  ;;  %v256_v10 = vld [vmem:[%s1996_s4 + $0x98] sm:$0xff]  ;;  %v241_v11 = vld [vmem:[%s1996_s4 + $0x20] sm:$0xff]  ;;  %v242_v13 = vld [vmem:[%s1996_s4 + $0x28] sm:$0xff]  ;;  %p1829_p12 = scmp.ne.s32.totalorder %s2843_s26, %s1828_s30 }
  0x1e   : > { %439 = vmatprep.mubr.f32.mxu0 %v1906_v0  ;;  %535 = vmatprep.mubr.f32.mxu1 %v1906_v0  ;;  %v257_v12 = vld [vmem:[%s1996_s4 + $0xa0] sm:$0xff]  ;;  %v258_v14 = vld [vmem:[%s1996_s4 + $0xa8] sm:$0xff]  ;;  %v243_v15 = vld [vmem:[%s1996_s4 + $0x30] sm:$0xff] }
  0x1f   : > { %v259_v16 = vld [vmem:[%s1996_s4 + $0xb0] sm:$0xff]  ;;  %v244_v17 = vld [vmem:[%s1996_s4 + $0x38] sm:$0xff]  ;;  %v245_v19 = vld [vmem:[%s1996_s4 + $0x40] sm:$0xff]  ;;  %p1830_p13 = pnand %p1829_p12, %p1970_p4 }
  0x20   : > { %v260_v18 = vld [vmem:[%s1996_s4 + $0xb8] sm:$0xff]  ;;  %v261_v20 = vld [vmem:[%s1996_s4 + $0xc0] sm:$0xff]  ;;  %v246_v21 = vld [vmem:[%s1996_s4 + $0x48] sm:$0xff] }
  0x21   : > { %1537 = vmatmul.mubr.msk.f32.gmra.mxu0 %vm272_vm0, %v238_v5  ;;  %1553 = vmatmul.mubr.msk.f32.gmra.mxu1 %vm272_vm0, %v254_v6  ;;  %v262_v22 = vld [vmem:[%s1996_s4 + $0xc8] sm:$0xff]  ;;  %v247_v23 = vld [vmem:[%s1996_s4 + $0x50] sm:$0xff]  ;;  %v248_v25 = vld [vmem:[%s1996_s4 + $0x58] sm:$0xff]  ;;  %p1831_p0 = pneg %p1830_p13 }
  0x22   : > { %445 = vmatprep.mubr.f32.mxu0 %v1906_v0  ;;  %541 = vmatprep.mubr.f32.mxu1 %v1906_v0  ;;  %v263_v24 = vld [vmem:[%s1996_s4 + $0xd0] sm:$0xff]  ;;  %v264_v26 = vld [vmem:[%s1996_s4 + $0xd8] sm:$0xff]  ;;  %v249_v27 = vld [vmem:[%s1996_s4 + $0x60] sm:$0xff] }
  0x23   : > { %v265_v28 = vld [vmem:[%s1996_s4 + $0xe0] sm:$0xff]  ;;  %v250_v29 = vld [vmem:[%s1996_s4 + $0x68] sm:$0xff]  ;;  %v251_v31 = vld [vmem:[%s1996_s4 + $0x70] sm:$0xff] }
  0x24   : > { %v266_v30 = vld [vmem:[%s1996_s4 + $0xe8] sm:$0xff]  ;;  %v267_v32 = vld [vmem:[%s1996_s4 + $0xf0] sm:$0xff]  ;;  %v252_v33 = vld [vmem:[%s1996_s4 + $0x78] sm:$0xff] }
  0x25   : > { %1538 = vmatmul.mubr.msk.f32.gmra.mxu0 %vm272_vm0, %v239_v7  ;;  %1554 = vmatmul.mubr.msk.f32.gmra.mxu1 %vm272_vm0, %v255_v8  ;;  %v268_v34 = vld [vmem:[%s1996_s4 + $0xf8] sm:$0xff]  ;;  %v271_v39 = vld [vmem:[%s235_s11] sm:$0x3]  ;;  %s1907_s4 = smov [#allocation2]  }
  0x26   : > { %451 = vmatprep.mubr.f32.mxu0 %v1906_v0  ;;  %547 = vmatprep.mubr.f32.mxu1 %v1906_v0  ;;  %v2099_v42 = vrot.slane %v271_v39, %v693_v37  ;;  %v2101_v43 = vrot.slane %v271_v39, %v697_v38  ;;  %s1832_s5 = sshll.u32 %s1907_s4, 4  ;;  %s1833_s5 = int_to_ptr.vmem [resolvable:$false] %s1832_s5 }
  0x27   : > { %s1834_s6 = scalar_lea.vmem %s1833_s5, 16384  ;;  %p1835_p1 = scmp.lt.s32.totalorder %s2843_s26, %s1833_s5 }
  0x28   : > { %p1836_p2 = scmp.lt.s32.totalorder %s1834_s6, %s1828_s30 }
  0x29   : > { %1539 = vmatmul.mubr.msk.f32.gmra.mxu0 %vm272_vm0, %v240_v9  ;;  %1555 = vmatmul.mubr.msk.f32.gmra.mxu1 %vm272_vm0, %v256_v10 }
  0x2a   : > { %457 = vmatprep.mubr.f32.mxu0 %v1906_v0  ;;  %553 = vmatprep.mubr.f32.mxu1 %v1906_v0  ;;  %p1837_p3 = por %p1836_p2, %p1835_p1 }
  0x2c   : > { %p1838_p5 = pnand %p1837_p3, %p1831_p0 }
  0x2d   : > { %1540 = vmatmul.mubr.msk.f32.gmra.mxu0 %vm272_vm0, %v241_v11  ;;  %1556 = vmatmul.mubr.msk.f32.gmra.mxu1 %vm272_vm0, %v257_v12 }
  0x2e   : > { %463 = vmatprep.mubr.f32.mxu0 %v1906_v0  ;;  %559 = vmatprep.mubr.f32.mxu1 %v1906_v0 }
  0x31   : > { %1541 = vmatmul.mubr.msk.f32.gmra.mxu0 %vm272_vm0, %v242_v13  ;;  %1557 = vmatmul.mubr.msk.f32.gmra.mxu1 %vm272_vm0, %v258_v14 }
  0x32   : > { %469 = vmatprep.mubr.f32.mxu0 %v1906_v0  ;;  %565 = vmatprep.mubr.f32.mxu1 %v1906_v0 }
  0x35   : > { %1542 = vmatmul.mubr.msk.f32.gmra.mxu0 %vm272_vm0, %v243_v15  ;;  %1558 = vmatmul.mubr.msk.f32.gmra.mxu1 %vm272_vm0, %v259_v16 }
  0x36   : > { %475 = vmatprep.mubr.f32.mxu0 %v1906_v0  ;;  %571 = vmatprep.mubr.f32.mxu1 %v1906_v0 }
  0x39   : > { %1543 = vmatmul.mubr.msk.f32.gmra.mxu0 %vm272_vm0, %v244_v17  ;;  %1559 = vmatmul.mubr.msk.f32.gmra.mxu1 %vm272_vm0, %v260_v18 }
  0x3a   : > { %481 = vmatprep.mubr.f32.mxu0 %v1906_v0  ;;  %577 = vmatprep.mubr.f32.mxu1 %v1906_v0 }
  0x3d   : > { %1544 = vmatmul.mubr.msk.f32.gmra.mxu0 %vm272_vm0, %v245_v19  ;;  %1560 = vmatmul.mubr.msk.f32.gmra.mxu1 %vm272_vm0, %v261_v20 }
  0x3e   : > { %487 = vmatprep.mubr.f32.mxu0 %v1906_v0  ;;  %583 = vmatprep.mubr.f32.mxu1 %v1906_v0 }
  0x41   : > { %1545 = vmatmul.mubr.msk.f32.gmra.mxu0 %vm272_vm0, %v246_v21  ;;  %1561 = vmatmul.mubr.msk.f32.gmra.mxu1 %vm272_vm0, %v262_v22 }
  0x42   : > { %493 = vmatprep.mubr.f32.mxu0 %v1906_v0  ;;  %589 = vmatprep.mubr.f32.mxu1 %v1906_v0 }
  0x45   : > { %1546 = vmatmul.mubr.msk.f32.gmra.mxu0 %vm272_vm0, %v247_v23  ;;  %1562 = vmatmul.mubr.msk.f32.gmra.mxu1 %vm272_vm0, %v263_v24 }
  0x46   : > { %499 = vmatprep.mubr.f32.mxu0 %v1906_v0  ;;  %595 = vmatprep.mubr.f32.mxu1 %v1906_v0 }
  0x49   : > { %1547 = vmatmul.mubr.msk.f32.gmra.mxu0 %vm272_vm0, %v248_v25  ;;  %1563 = vmatmul.mubr.msk.f32.gmra.mxu1 %vm272_vm0, %v264_v26 }
  0x4a   : > { %505 = vmatprep.mubr.f32.mxu0 %v1906_v0  ;;  %601 = vmatprep.mubr.f32.mxu1 %v1906_v0 }
  0x4d   : > { %1548 = vmatmul.mubr.msk.f32.gmra.mxu0 %vm272_vm0, %v249_v27  ;;  %1564 = vmatmul.mubr.msk.f32.gmra.mxu1 %vm272_vm0, %v265_v28 }
  0x4e   : > { %511 = vmatprep.mubr.f32.mxu0 %v1906_v0  ;;  %607 = vmatprep.mubr.f32.mxu1 %v1906_v0 }
  0x51   : > { %1549 = vmatmul.mubr.msk.f32.gmra.mxu0 %vm272_vm0, %v250_v29  ;;  %1565 = vmatmul.mubr.msk.f32.gmra.mxu1 %vm272_vm0, %v266_v30 }
  0x52   : > { %517 = vmatprep.mubr.f32.mxu0 %v1906_v0  ;;  %613 = vmatprep.mubr.f32.mxu1 %v1906_v0 }
  0x55   : > { %1550 = vmatmul.mubr.msk.f32.gmra.mxu0 %vm272_vm0, %v251_v31  ;;  %1566 = vmatmul.mubr.msk.f32.gmra.mxu1 %vm272_vm0, %v267_v32 }
  0x56   : > { %523 = vmatprep.mubr.f32.mxu0 %v1906_v0  ;;  %619 = vmatprep.mubr.f32.mxu1 %v1906_v0 }
  0x59   : > { %1551 = vmatmul.mubr.msk.f32.gmra.mxu0 %vm272_vm0, %v252_v33  ;;  %1567 = vmatmul.mubr.msk.f32.gmra.mxu1 %vm272_vm0, %v268_v34 }
  0xdd   : > { %v435_v40 = vpop.f32.mrf.mxu0  ;;  %v531_v41 = vpop.f32.mrf.mxu1 }
  0xde   : > { %v626_v44 = vmul.f32 2.0, %v435_v40  ;;  %v658_v45 = vmul.f32 2.0, %v531_v41 }
  0xdf   : > { %v437_v46 = vpop.f32.mrf.mxu0  ;;  %v533_v47 = vpop.f32.mrf.mxu1 }
  0xe0   : > { %v627_v48 = vmul.f32 2.0, %v437_v46  ;;  %v659_v49 = vmul.f32 2.0, %v533_v47  ;;  %v2104_v53 = vsub.f32 %v626_v44, %v2099_v42  ;;  %v2110_v55 = vsub.f32 %v658_v45, %v2099_v42 }
  0xe1   : > { %v441_v50 = vpop.f32.mrf.mxu0  ;;  %v537_v51 = vpop.f32.mrf.mxu1 }
  0xe2   : > { %v660_v52 = vmul.f32 2.0, %v537_v51  ;;  %v2107_v54 = vsub.f32 %v627_v48, %v2101_v43  ;;  %v2113_v56 = vsub.f32 %v659_v49, %v2101_v43  ;;  %v628_v57 = vmul.f32 2.0, %v441_v50 }
  0xe3   : > { %v443_v58 = vpop.f32.mrf.mxu0  ;;  %v539_v59 = vpop.f32.mrf.mxu1 }
  0xe4   : > { %v629_v60 = vmul.f32 2.0, %v443_v58  ;;  %v661_v61 = vmul.f32 2.0, %v539_v59  ;;  %v765_v62 = vmax.f32 %v2104_v53, %v2107_v54  ;;  %v2118_v1 = vsub.f32 %v660_v52, %v2099_v42 }
  0xe5   : > { %v447_v63 = vpop.f32.mrf.mxu0  ;;  %v543_v0 = vpop.f32.mrf.mxu1  ;;  %v2124_v5 = vsub.f32 %v628_v57, %v2099_v42  ;;  %v813_v7 = vmax.f32 %v2110_v55, %v2113_v56 }
  0xe6   : > { %v630_v2 = vmul.f32 2.0, %v447_v63  ;;  %766 = vmax.xlane.f32.xlu0 %v765_v62  ;;  %v662_v3 = vmul.f32 2.0, %v543_v0  ;;  %v2121_v4 = vsub.f32 %v661_v61, %v2101_v43  ;;  %v2129_v9 = vsub.f32 %v629_v60, %v2101_v43 }
  0xe7   : > { %v449_v6 = vpop.f32.mrf.mxu0  ;;  %v545_v8 = vpop.f32.mrf.mxu1 }
  0xe8   : > { %v2132_v10 = vsub.f32 %v630_v2, %v2099_v42  ;;  %v631_v11 = vmul.f32 2.0, %v449_v6  ;;  %v816_v12 = vmax.f32 %v2118_v1, %v2121_v4  ;;  %v663_v14 = vmul.f32 2.0, %v545_v8 }
  0xe9   : > { %v453_v13 = vpop.f32.mrf.mxu0  ;;  %v549_v15 = vpop.f32.mrf.mxu1  ;;  %v2140_v18 = vsub.f32 %v662_v3, %v2099_v42  ;;  %v768_v25 = vmax.f32 %v2124_v5, %v2129_v9 }
  0xea   : > { %v2137_v16 = vsub.f32 %v631_v11, %v2101_v43  ;;  %v632_v17 = vmul.f32 2.0, %v453_v13  ;;  %817 = vmax.xlane.f32.xlu1 %v816_v12  ;;  %814 = vmax.xlane.f32.xlu0 %v813_v7  ;;  %v664_v19 = vmul.f32 2.0, %v549_v15  ;;  %v2143_v21 = vsub.f32 %v663_v14, %v2101_v43 }
  0xeb   : > { %v455_v20 = vpop.f32.mrf.mxu0  ;;  %v551_v22 = vpop.f32.mrf.mxu1 }
  0xec   : > { %v2146_v23 = vsub.f32 %v632_v17, %v2099_v42  ;;  %v633_v24 = vmul.f32 2.0, %v455_v20  ;;  %v771_v26 = vmax.f32 %v2132_v10, %v2137_v16  ;;  %v2153_v28 = vsub.f32 %v664_v19, %v2099_v42 }
  0xed   : > { %v459_v27 = vpop.f32.mrf.mxu0  ;;  %v665_v29 = vmul.f32 2.0, %v551_v22  ;;  %v555_v30 = vpop.f32.mrf.mxu1  ;;  %v819_v34 = vmax.f32 %v2140_v18, %v2143_v21 }
  0xee   : > { %v2156_v31 = vsub.f32 %v633_v24, %v2101_v43  ;;  %v634_v32 = vmul.f32 2.0, %v459_v27  ;;  %769 = vmax.xlane.f32.xlu0 %v768_v25  ;;  %772 = vmax.xlane.f32.xlu1 %v771_v26  ;;  %v666_v33 = vmul.f32 2.0, %v555_v30 }
  0xef   : > { %v461_v35 = vpop.f32.mrf.mxu0  ;;  %v2161_v36 = vsub.f32 %v665_v29, %v2101_v43  ;;  %v557_v37 = vpop.f32.mrf.mxu1 }
  0xf0   : > { %v2164_v38 = vsub.f32 %v634_v32, %v2099_v42  ;;  %v635_v39 = vmul.f32 2.0, %v461_v35  ;;  %v774_v40 = vmax.f32 %v2146_v23, %v2156_v31  ;;  %v2169_v44 = vsub.f32 %v666_v33, %v2099_v42 }
  0xf1   : > { %v465_v41 = vpop.f32.mrf.mxu0  ;;  %v667_v45 = vmul.f32 2.0, %v557_v37  ;;  %v561_v46 = vpop.f32.mrf.mxu1  ;;  %v822_v50 = vmax.f32 %v2153_v28, %v2161_v36 }
  0xf2   : > { %v2172_v47 = vsub.f32 %v635_v39, %v2101_v43  ;;  %v636_v48 = vmul.f32 2.0, %v465_v41  ;;  %820 = vmax.xlane.f32.xlu0 %v819_v34  ;;  %775 = vmax.xlane.f32.xlu1 %v774_v40  ;;  %v668_v49 = vmul.f32 2.0, %v561_v46 }
  0xf3   : > { %v467_v51 = vpop.f32.mrf.mxu0  ;;  %v2177_v52 = vsub.f32 %v667_v45, %v2101_v43  ;;  %v563_v57 = vpop.f32.mrf.mxu1 }
  0xf4   : > { %v2180_v58 = vsub.f32 %v636_v48, %v2099_v42  ;;  %v637_v59 = vmul.f32 2.0, %v467_v51  ;;  %v777_v60 = vmax.f32 %v2164_v38, %v2172_v47  ;;  %v2185_v62 = vsub.f32 %v668_v49, %v2099_v42 }
  0xf5   : > { %v471_v61 = vpop.f32.mrf.mxu0  ;;  %v669_v63 = vmul.f32 2.0, %v563_v57  ;;  %v567_v0 = vpop.f32.mrf.mxu1  ;;  %v825_v7 = vmax.f32 %v2169_v44, %v2177_v52 }
  0xf6   : > { %v2188_v2 = vsub.f32 %v637_v59, %v2101_v43  ;;  %v638_v3 = vmul.f32 2.0, %v471_v61  ;;  %823 = vmax.xlane.f32.xlu1 %v822_v50  ;;  %778 = vmax.xlane.f32.xlu0 %v777_v60  ;;  %v670_v6 = vmul.f32 2.0, %v567_v0 }
  0xf7   : > { %v473_v8 = vpop.f32.mrf.mxu0  ;;  %v2193_v11 = vsub.f32 %v669_v63, %v2101_v43  ;;  %v569_v12 = vpop.f32.mrf.mxu1 }
  0xf8   : > { %v2196_v13 = vsub.f32 %v638_v3, %v2099_v42  ;;  %v639_v14 = vmul.f32 2.0, %v473_v8  ;;  %v780_v15 = vmax.f32 %v2180_v58, %v2188_v2  ;;  %v2201_v19 = vsub.f32 %v670_v6, %v2099_v42 }
  0xf9   : > { %v477_v17 = vpop.f32.mrf.mxu0  ;;  %v671_v20 = vmul.f32 2.0, %v569_v12  ;;  %v573_v22 = vpop.f32.mrf.mxu1  ;;  %v828_v27 = vmax.f32 %v2185_v62, %v2193_v11 }
  0xfa   : > { %v2204_v24 = vsub.f32 %v639_v14, %v2101_v43  ;;  %v640_v25 = vmul.f32 2.0, %v477_v17  ;;  %826 = vmax.xlane.f32.xlu0 %v825_v7  ;;  %781 = vmax.xlane.f32.xlu1 %v780_v15  ;;  %v672_v26 = vmul.f32 2.0, %v573_v22 }
  0xfb   : > { %v479_v29 = vpop.f32.mrf.mxu0  ;;  %v2209_v30 = vsub.f32 %v671_v20, %v2101_v43  ;;  %v575_v32 = vpop.f32.mrf.mxu1 }
  0xfc   : > { %v2212_v33 = vsub.f32 %v640_v25, %v2099_v42  ;;  %v641_v34 = vmul.f32 2.0, %v479_v29  ;;  %v783_v35 = vmax.f32 %v2196_v13, %v2204_v24  ;;  %v2217_v39 = vsub.f32 %v672_v26, %v2099_v42 }
  0xfd   : > { %v483_v37 = vpop.f32.mrf.mxu0  ;;  %v673_v40 = vmul.f32 2.0, %v575_v32  ;;  %v579_v41 = vpop.f32.mrf.mxu1  ;;  %v831_v49 = vmax.f32 %v2201_v19, %v2209_v30 }
  0xfe   : > { %v2220_v45 = vsub.f32 %v641_v34, %v2101_v43  ;;  %v642_v46 = vmul.f32 2.0, %v483_v37  ;;  %829 = vmax.xlane.f32.xlu1 %v828_v27  ;;  %784 = vmax.xlane.f32.xlu0 %v783_v35  ;;  %v674_v48 = vmul.f32 2.0, %v579_v41 }
  0xff   : > { %v485_v50 = vpop.f32.mrf.mxu0  ;;  %v2225_v51 = vsub.f32 %v673_v40, %v2101_v43  ;;  %v581_v57 = vpop.f32.mrf.mxu1 }
 0x100   : > { %v2228_v59 = vsub.f32 %v642_v46, %v2099_v42  ;;  %v643_v60 = vmul.f32 2.0, %v485_v50  ;;  %v786_v61 = vmax.f32 %v2212_v33, %v2220_v45  ;;  %v2233_v0 = vsub.f32 %v674_v48, %v2099_v42 }
 0x101   : > { %v489_v63 = vpop.f32.mrf.mxu0  ;;  %v675_v3 = vmul.f32 2.0, %v581_v57  ;;  %v585_v6 = vpop.f32.mrf.mxu1  ;;  %v834_v14 = vmax.f32 %v2217_v39, %v2225_v51 }
 0x102   : > { %v2236_v7 = vsub.f32 %v643_v60, %v2101_v43  ;;  %v644_v8 = vmul.f32 2.0, %v489_v63  ;;  %832 = vmax.xlane.f32.xlu0 %v831_v49  ;;  %787 = vmax.xlane.f32.xlu1 %v786_v61  ;;  %v676_v12 = vmul.f32 2.0, %v585_v6 }
 0x103   : > { %v491_v15 = vpop.f32.mrf.mxu0  ;;  %v2241_v17 = vsub.f32 %v675_v3, %v2101_v43  ;;  %v587_v20 = vpop.f32.mrf.mxu1 }
 0x104   : > { %v2244_v22 = vsub.f32 %v644_v8, %v2099_v42  ;;  %v645_v25 = vmul.f32 2.0, %v491_v15  ;;  %v789_v26 = vmax.f32 %v2228_v59, %v2236_v7  ;;  %v2249_v29 = vsub.f32 %v676_v12, %v2099_v42 }
 0x105   : > { %v495_v27 = vpop.f32.mrf.mxu0  ;;  %v677_v32 = vmul.f32 2.0, %v587_v20  ;;  %v591_v34 = vpop.f32.mrf.mxu1  ;;  %v837_v41 = vmax.f32 %v2233_v0, %v2241_v17 }
 0x106   : > { %v2252_v35 = vsub.f32 %v645_v25, %v2101_v43  ;;  %v646_v37 = vmul.f32 2.0, %v495_v27  ;;  %835 = vmax.xlane.f32.xlu1 %v834_v14  ;;  %790 = vmax.xlane.f32.xlu0 %v789_v26  ;;  %v678_v40 = vmul.f32 2.0, %v591_v34 }
 0x107   : > { %v497_v46 = vpop.f32.mrf.mxu0  ;;  %v2257_v48 = vsub.f32 %v677_v32, %v2101_v43  ;;  %v593_v49 = vpop.f32.mrf.mxu1 }
 0x108   : > { %v2260_v50 = vsub.f32 %v646_v37, %v2099_v42  ;;  %v647_v57 = vmul.f32 2.0, %v497_v46  ;;  %v792_v60 = vmax.f32 %v2244_v22, %v2252_v35  ;;  %v2265_v63 = vsub.f32 %v678_v40, %v2099_v42 }
 0x109   : > { %v501_v61 = vpop.f32.mrf.mxu0  ;;  %v679_v3 = vmul.f32 2.0, %v593_v49  ;;  %v597_v6 = vpop.f32.mrf.mxu1  ;;  %v840_v15 = vmax.f32 %v2249_v29, %v2257_v48 }
 0x10a   : > { %2939 = vst [vmem:[#allocation5_spill] sm:$0xff] %v2265_v63  ;;  %v2268_v8 = vsub.f32 %v647_v57, %v2101_v43  ;;  %v648_v12 = vmul.f32 2.0, %v501_v61  ;;  %838 = vmax.xlane.f32.xlu0 %v837_v41  ;;  %793 = vmax.xlane.f32.xlu1 %v792_v60  ;;  %v680_v14 = vmul.f32 2.0, %v597_v6 }
 0x10b   : > { %v503_v20 = vpop.f32.mrf.mxu0  ;;  %v2273_v25 = vsub.f32 %v679_v3, %v2101_v43  ;;  %v599_v26 = vpop.f32.mrf.mxu1 }
 0x10c   : > { %v2276_v27 = vsub.f32 %v648_v12, %v2099_v42  ;;  %v649_v32 = vmul.f32 2.0, %v503_v20  ;;  %v795_v34 = vmax.f32 %v2260_v50, %v2268_v8  ;;  %v2281_v40 = vsub.f32 %v680_v14, %v2099_v42 }
 0x10d   : > { %2940 = vst [vmem:[#allocation6_spill] sm:$0xff] %v2273_v25  ;;  %v507_v37 = vpop.f32.mrf.mxu0  ;;  %v681_v41 = vmul.f32 2.0, %v599_v26  ;;  %v603_v46 = vpop.f32.mrf.mxu1  ;;  %v843_v61 = vmax.f32 %v2265_v63, %v2273_v25 }
 0x10e   : > { %2941 = vst [vmem:[#allocation7_spill] sm:$0xff] %v2276_v27  ;;  %2942 = vst [vmem:[#allocation8_spill] sm:$0xff] %v2281_v40  ;;  %v2284_v49 = vsub.f32 %v649_v32, %v2101_v43  ;;  %v650_v57 = vmul.f32 2.0, %v507_v37  ;;  %841 = vmax.xlane.f32.xlu1 %v840_v15  ;;  %796 = vmax.xlane.f32.xlu0 %v795_v34  ;;  %v682_v60 = vmul.f32 2.0, %v603_v46 }
 0x10f   : > { %v509_v3 = vpop.f32.mrf.mxu0  ;;  %v2289_v6 = vsub.f32 %v681_v41, %v2101_v43  ;;  %v605_v12 = vpop.f32.mrf.mxu1 }
 0x110   : > { %2943 = vst [vmem:[#allocation9_spill] sm:$0xff] %v2284_v49  ;;  %v2292_v14 = vsub.f32 %v650_v57, %v2099_v42  ;;  %v651_v20 = vmul.f32 2.0, %v509_v3  ;;  %v798_v26 = vmax.f32 %v2276_v27, %v2284_v49  ;;  %v2297_v15 = vsub.f32 %v682_v60, %v2099_v42 }
 0x111   : > { %2944 = vst [vmem:[#allocation10_spill] sm:$0xff] %v2289_v6  ;;  %v513_v32 = vpop.f32.mrf.mxu0  ;;  %v683_v34 = vmul.f32 2.0, %v605_v12  ;;  %v609_v37 = vpop.f32.mrf.mxu1  ;;  %v846_v57 = vmax.f32 %v2281_v40, %v2289_v6 }
 0x112   : > { %2945 = vst [vmem:[#allocation11_spill] sm:$0xff] %v2292_v14  ;;  %2946 = vst [vmem:[#allocation12_spill] sm:$0xff] %v2297_v15  ;;  %v2300_v46 = vsub.f32 %v651_v20, %v2101_v43  ;;  %v652_v25 = vmul.f32 2.0, %v513_v32  ;;  %844 = vmax.xlane.f32.xlu0 %v843_v61  ;;  %799 = vmax.xlane.f32.xlu1 %v798_v26  ;;  %v684_v41 = vmul.f32 2.0, %v609_v37 }
 0x113   : > { %v515_v3 = vpop.f32.mrf.mxu0  ;;  %v2305_v63 = vsub.f32 %v683_v34, %v2101_v43  ;;  %v611_v49 = vpop.f32.mrf.mxu1 }
 0x114   : > { %2947 = vst [vmem:[#allocation13_spill] sm:$0xff] %v2300_v46  ;;  %v2308_v60 = vsub.f32 %v652_v25, %v2099_v42  ;;  %v653_v12 = vmul.f32 2.0, %v515_v3  ;;  %v801_v20 = vmax.f32 %v2292_v14, %v2300_v46  ;;  %v2313_v61 = vsub.f32 %v684_v41, %v2099_v42 }
 0x115   : > { %2948 = vst [vmem:[#allocation14_spill] sm:$0xff] %v2305_v63  ;;  %v519_v27 = vpop.f32.mrf.mxu0  ;;  %v685_v26 = vmul.f32 2.0, %v611_v49  ;;  %v615_v32 = vpop.f32.mrf.mxu1  ;;  %v849_v25 = vmax.f32 %v2297_v15, %v2305_v63 }
 0x116   : > { %2949 = vst [vmem:[#allocation15_spill] sm:$0xff] %v2308_v60  ;;  %v2316_v37 = vsub.f32 %v653_v12, %v2101_v43  ;;  %v654_v6 = vmul.f32 2.0, %v519_v27  ;;  %847 = vmax.xlane.f32.xlu1 %v846_v57  ;;  %802 = vmax.xlane.f32.xlu0 %v801_v20  ;;  %v686_v34 = vmul.f32 2.0, %v615_v32 }
 0x117   : > { %v521_v3 = vpop.f32.mrf.mxu0  ;;  %v2321_v40 = vsub.f32 %v685_v26, %v2101_v43  ;;  %v617_v46 = vpop.f32.mrf.mxu1 }
 0x118   : > { %2950 = vst [vmem:[#allocation16_spill] sm:$0xff] %v2316_v37  ;;  %v2324_v41 = vsub.f32 %v654_v6, %v2099_v42  ;;  %v655_v49 = vmul.f32 2.0, %v521_v3  ;;  %v804_v12 = vmax.f32 %v2308_v60, %v2316_v37  ;;  %v2329_v27 = vsub.f32 %v686_v34, %v2099_v42 }
 0x119   : > { %v525_v14 = vpop.f32.mrf.mxu0  ;;  %v687_v57 = vmul.f32 2.0, %v617_v46  ;;  %v621_v20 = vpop.f32.mrf.mxu1  ;;  %v852_v6 = vmax.f32 %v2313_v61, %v2321_v40 }
 0x11a   : > { %v2332_v32 = vsub.f32 %v655_v49, %v2101_v43  ;;  %v656_v63 = vmul.f32 2.0, %v525_v14  ;;  %850 = vmax.xlane.f32.xlu0 %v849_v25  ;;  %805 = vmax.xlane.f32.xlu1 %v804_v12  ;;  %v688_v26 = vmul.f32 2.0, %v621_v20 }
 0x11b   : > { %v527_v3 = vpop.f32.mrf.mxu0  ;;  %v2337_v15 = vsub.f32 %v687_v57, %v2101_v43  ;;  %v623_v37 = vpop.f32.mrf.mxu1 }
 0x11c   : > { %v2340_v34 = vsub.f32 %v656_v63, %v2099_v42  ;;  %v657_v46 = vmul.f32 2.0, %v527_v3  ;;  %v807_v49 = vmax.f32 %v2324_v41, %v2332_v32  ;;  %v689_v60 = vmul.f32 2.0, %v623_v37 }
 0x11d   : > { %v2348_v25 = vsub.f32 %v688_v26, %v2099_v42  ;;  %v855_v12 = vmax.f32 %v2329_v27, %v2337_v15 }
 0x11e   : > { %v2345_v14 = vsub.f32 %v657_v46, %v2101_v43  ;;  %853 = vmax.xlane.f32.xlu1 %v852_v6  ;;  %808 = vmax.xlane.f32.xlu0 %v807_v49  ;;  %v2353_v57 = vsub.f32 %v689_v60, %v2101_v43 }
 0x11f   : > { %2952 = vst [vmem:[#allocation18_spill] sm:$0xff] %v2348_v25 }
 0x120   : > { %2951 = vst [vmem:[#allocation17_spill] sm:$0xff] %v2345_v14  ;;  %2953 = vst [vmem:[#allocation19_spill] sm:$0xff] %v2353_v57  ;;  %v810_v63 = vmax.f32 %v2340_v34, %v2345_v14  ;;  %v858_v37 = vmax.f32 %v2348_v25, %v2353_v57 }
 0x122   : > { %856 = vmax.xlane.f32.xlu0 %v855_v12  ;;  %811 = vmax.xlane.f32.xlu1 %v810_v63 }
 0x126   : > { %859 = vmax.xlane.f32.xlu1 %v858_v37 }
 0x16f   : > { %v767_v20 = vpop.xlane.xlu0 %766 }
 0x170   : > { %v861_v42 = vsub.f32 %v2104_v53, %v767_v20  ;;  %v862_v26 = vsub.f32 %v2107_v54, %v767_v20 }
 0x172   : > { %v925_v6 = vmul.f32 1.442695, %v861_v42  ;;  %v927_v3 = vmul.f32 1.442695, %v862_v26 }
 0x173   : > { %v818_v46 = vpop.xlane.xlu1 %817  ;;  %v815_v49 = vpop.xlane.xlu0 %814 }
 0x174   : > { %1636 = vpow2.f32 %v925_v6  ;;  %v895_v43 = vsub.f32 %v2118_v1, %v818_v46  ;;  %v896_v60 = vsub.f32 %v2121_v4, %v818_v46  ;;  %v893_v12 = vsub.f32 %v2110_v55, %v815_v49 }
 0x175   : > { %1638 = vpow2.f32 %v927_v3  ;;  %v894_v63 = vsub.f32 %v2113_v56, %v815_v49 }
 0x176   : > { %v993_v37 = vmul.f32 1.442695, %v895_v43  ;;  %v995_v57 = vmul.f32 1.442695, %v896_v60  ;;  %v989_v25 = vmul.f32 1.442695, %v893_v12 }
 0x177   : > { %v991_v53 = vmul.f32 1.442695, %v894_v63  ;;  %v770_v14 = vpop.xlane.xlu0 %769  ;;  %v773_v54 = vpop.xlane.xlu1 %772 }
 0x178   : > { %1640 = vpow2.f32 %v993_v37  ;;  %v863_v20 = vsub.f32 %v2124_v5, %v770_v14  ;;  %v864_v42 = vsub.f32 %v2129_v9, %v770_v14  ;;  %v865_v1 = vsub.f32 %v2132_v10, %v773_v54 }
 0x179   : > { %1642 = vpow2.f32 %v995_v57  ;;  %v866_v4 = vsub.f32 %v2137_v16, %v773_v54 }
 0x17a   : > { %1644 = vpow2.f32 %v989_v25  ;;  %v929_v55 = vmul.f32 1.442695, %v863_v20  ;;  %v931_v26 = vmul.f32 1.442695, %v864_v42  ;;  %v933_v56 = vmul.f32 1.442695, %v865_v1 }
 0x17b   : > { %1646 = vpow2.f32 %v991_v53  ;;  %v935_v6 = vmul.f32 1.442695, %v866_v4  ;;  %v821_v3 = vpop.xlane.xlu0 %820  ;;  %v776_v46 = vpop.xlane.xlu1 %775 }
 0x17c   : > { %1648 = vpow2.f32 %v929_v55  ;;  %v897_v49 = vsub.f32 %v2140_v18, %v821_v3  ;;  %v898_v5 = vsub.f32 %v2143_v21, %v821_v3  ;;  %v867_v9 = vsub.f32 %v2146_v23, %v776_v46 }
 0x17d   : > { %1650 = vpow2.f32 %v931_v26  ;;  %v868_v10 = vsub.f32 %v2156_v31, %v776_v46 }
 0x17e   : > { %1652 = vpow2.f32 %v933_v56  ;;  %v997_v16 = vmul.f32 1.442695, %v897_v49  ;;  %v999_v14 = vmul.f32 1.442695, %v898_v5  ;;  %v937_v25 = vmul.f32 1.442695, %v867_v9 }
 0x17f   : > { %1654 = vpow2.f32 %v935_v6  ;;  %v939_v57 = vmul.f32 1.442695, %v868_v10  ;;  %v824_v43 = vpop.xlane.xlu1 %823  ;;  %v779_v60 = vpop.xlane.xlu0 %778 }
 0x180   : > { %1656 = vpow2.f32 %v997_v16  ;;  %v899_v12 = vsub.f32 %v2153_v28, %v824_v43  ;;  %v900_v18 = vsub.f32 %v2161_v36, %v824_v43  ;;  %v869_v21 = vsub.f32 %v2164_v38, %v779_v60 }
 0x181   : > { %v2376_v63 = vpop.eup %1636  ;;  %1658 = vpow2.f32 %v999_v14  ;;  %v870_v23 = vsub.f32 %v2172_v47, %v779_v60 }
 0x182   : > { %v2379_v31 = vpop.eup %1638  ;;  %1660 = vpow2.f32 %v937_v25  ;;  %v1001_v37 = vmul.f32 1.442695, %v899_v12  ;;  %v1003_v53 = vmul.f32 1.442695, %v900_v18  ;;  %v941_v54 = vmul.f32 1.442695, %v869_v21 }
 0x183   : > { %1662 = vpow2.f32 %v939_v57  ;;  %v943_v20 = vmul.f32 1.442695, %v870_v23  ;;  %v827_v42 = vpop.xlane.xlu0 %826  ;;  %v782_v1 = vpop.xlane.xlu1 %781  ;;  %v1053_v28 = vadd.f32 %v2379_v31, %v2376_v63 }
 0x184   : > { %1664 = vpow2.f32 %v1001_v37  ;;  %v901_v36 = vsub.f32 %v2169_v44, %v827_v42  ;;  %v902_v38 = vsub.f32 %v2177_v52, %v827_v42  ;;  %v871_v47 = vsub.f32 %v2180_v58, %v782_v1 }
 0x185   : > { %v2386_v4 = vpop.eup %1640  ;;  %1666 = vpow2.f32 %v1003_v53  ;;  %v872_v55 = vsub.f32 %v2188_v2, %v782_v1  ;;  %1054 = vadd.xlane.f32.xlu0 %v1053_v28 }
 0x186   : > { %v2389_v26 = vpop.eup %1642  ;;  %1668 = vpow2.f32 %v941_v54  ;;  %v1005_v56 = vmul.f32 1.442695, %v901_v36  ;;  %v1007_v6 = vmul.f32 1.442695, %v902_v38  ;;  %v945_v3 = vmul.f32 1.442695, %v871_v47 }
 0x187   : > { %v2391_v46 = vpop.eup %1644  ;;  %1670 = vpow2.f32 %v943_v20  ;;  %v947_v44 = vmul.f32 1.442695, %v872_v55  ;;  %v830_v49 = vpop.xlane.xlu1 %829  ;;  %v1104_v47 = vadd.f32 %v2389_v26, %v2386_v4 }
 0x188   : > { %v785_v52 = vpop.xlane.xlu0 %784  ;;  %v2393_v5 = vpop.eup %1646  ;;  %1672 = vpow2.f32 %v1005_v56  ;;  %v903_v58 = vsub.f32 %v2185_v62, %v830_v49  ;;  %v904_v2 = vsub.f32 %v2193_v11, %v830_v49 }
 0x189   : > { %v873_v9 = vsub.f32 %v2196_v13, %v785_v52  ;;  %v2398_v10 = vpop.eup %1648  ;;  %1674 = vpow2.f32 %v1007_v6  ;;  %v874_v16 = vsub.f32 %v2204_v24, %v785_v52  ;;  %v1101_v14 = vadd.f32 %v2393_v5, %v2391_v46 }
 0x18a   : > { %v2403_v25 = vpop.eup %1650  ;;  %1676 = vpow2.f32 %v945_v3  ;;  %v1009_v57 = vmul.f32 1.442695, %v903_v58  ;;  %v1011_v43 = vmul.f32 1.442695, %v904_v2 }
 0x18b   : > { %v949_v60 = vmul.f32 1.442695, %v873_v9  ;;  %v2405_v12 = vpop.eup %1652  ;;  %1678 = vpow2.f32 %v947_v44  ;;  %v951_v62 = vmul.f32 1.442695, %v874_v16  ;;  %1102 = vadd.xlane.f32.xlu0 %v1101_v14  ;;  %v788_v13 = vpop.xlane.xlu1 %787  ;;  %v1056_v18 = vadd.f32 %v2403_v25, %v2398_v10 }
 0x18c   : > { %v833_v11 = vpop.xlane.xlu0 %832  ;;  %v2409_v24 = vpop.eup %1654  ;;  %1680 = vpow2.f32 %v1009_v57  ;;  %v875_v37 = vsub.f32 %v2212_v33, %v788_v13  ;;  %v876_v54 = vsub.f32 %v2220_v45, %v788_v13 }
 0x18d   : > { %v905_v21 = vsub.f32 %v2201_v19, %v833_v11  ;;  %v906_v23 = vsub.f32 %v2209_v30, %v833_v11  ;;  %v2414_v53 = vpop.eup %1656  ;;  %1682 = vpow2.f32 %v1011_v43  ;;  %v1059_v20 = vadd.f32 %v2409_v24, %v2405_v12  ;;  %1057 = vadd.xlane.f32.xlu1 %v1056_v18 }
 0x18e   : > { %v2419_v42 = vpop.eup %1658  ;;  %1684 = vpow2.f32 %v949_v60  ;;  %v953_v36 = vmul.f32 1.442695, %v875_v37  ;;  %v955_v30 = vmul.f32 1.442695, %v876_v54 }
 0x18f   : > { %v1013_v1 = vmul.f32 1.442695, %v905_v21  ;;  %v1015_v28 = vmul.f32 1.442695, %v906_v23  ;;  %v2421_v19 = vpop.eup %1660  ;;  %1686 = vpow2.f32 %v951_v62  ;;  %1060 = vadd.xlane.f32.xlu0 %v1059_v20  ;;  %v836_v33 = vpop.xlane.xlu1 %835  ;;  %v1107_v45 = vadd.f32 %v2419_v42, %v2414_v53 }
 0x190   : > { %v791_v38 = vpop.xlane.xlu0 %790  ;;  %v2427_v55 = vpop.eup %1662  ;;  %v907_v56 = vsub.f32 %v2217_v39, %v836_v33  ;;  %v908_v6 = vsub.f32 %v2225_v51, %v836_v33 }
 0x191   : > { %1688 = vpow2.f32 %v1013_v1  ;;  %v877_v3 = vsub.f32 %v2228_v59, %v791_v38  ;;  %v2432_v44 = vpop.eup %1664  ;;  %v878_v49 = vsub.f32 %v2236_v7, %v791_v38  ;;  %1105 = vadd.xlane.f32.xlu1 %v1104_v47  ;;  %v1062_v59 = vadd.f32 %v2427_v55, %v2421_v19 }
 0x192   : > { %1690 = vpow2.f32 %v1015_v28  ;;  %v2435_v52 = vpop.eup %1666  ;;  %v1017_v58 = vmul.f32 1.442695, %v907_v56  ;;  %v1019_v2 = vmul.f32 1.442695, %v908_v6 }
 0x193   : > { %1692 = vpow2.f32 %v953_v36  ;;  %v957_v9 = vmul.f32 1.442695, %v877_v3  ;;  %v2437_v16 = vpop.eup %1668  ;;  %v959_v39 = vmul.f32 1.442695, %v878_v49  ;;  %1108 = vadd.xlane.f32.xlu0 %v1107_v45  ;;  %v794_v14 = vpop.xlane.xlu1 %793  ;;  %v1110_v20 = vadd.f32 %v2435_v52, %v2432_v44 }
 0x194   : > { %1694 = vpow2.f32 %v955_v30  ;;  %v839_v51 = vpop.xlane.xlu0 %838  ;;  %v2441_v57 = vpop.eup %1670  ;;  %v879_v60 = vsub.f32 %v2244_v22, %v794_v14  ;;  %v880_v11 = vsub.f32 %v2252_v35, %v794_v14 }
 0x195   : > { %1696 = vpow2.f32 %v1017_v58  ;;  %v909_v7 = vsub.f32 %v2233_v0, %v839_v51  ;;  %v910_v43 = vsub.f32 %v2241_v17, %v839_v51  ;;  %v2446_v62 = vpop.eup %1672  ;;  %v1065_v13 = vadd.f32 %v2441_v57, %v2437_v16  ;;  %1063 = vadd.xlane.f32.xlu1 %v1062_v59  ;;  %v2956_v51 = vld [vmem:[#allocation7_spill] sm:$0xff] }
 0x196   : > { %1698 = vpow2.f32 %v1019_v2  ;;  %v2451_v18 = vpop.eup %1674  ;;  %v961_v37 = vmul.f32 1.442695, %v879_v60  ;;  %v963_v17 = vmul.f32 1.442695, %v880_v11 }
 0x197   : > { %1700 = vpow2.f32 %v957_v9  ;;  %v1021_v21 = vmul.f32 1.442695, %v909_v7  ;;  %v1023_v23 = vmul.f32 1.442695, %v910_v43  ;;  %v2453_v0 = vpop.eup %1676  ;;  %1066 = vadd.xlane.f32.xlu0 %v1065_v13  ;;  %v842_v22 = vpop.xlane.xlu1 %841  ;;  %v1113_v35 = vadd.f32 %v2451_v18, %v2446_v62  ;;  %v2955_v9 = vld [vmem:[#allocation6_spill] sm:$0xff]  ;;  %v2957_v7 = vld [vmem:[#allocation9_spill] sm:$0xff] }
 0x198   : > { %1702 = vpow2.f32 %v959_v39  ;;  %v797_v54 = vpop.xlane.xlu0 %796  ;;  %v2459_v1 = vpop.eup %1678  ;;  %v911_v28 = vsub.f32 %v2249_v29, %v842_v22  ;;  %v912_v36 = vsub.f32 %v2257_v48, %v842_v22 }
 0x199   : > { %1704 = vpow2.f32 %v1021_v21  ;;  %v881_v30 = vsub.f32 %v2260_v50, %v797_v54  ;;  %v2464_v33 = vpop.eup %1680  ;;  %v882_v38 = vsub.f32 %v2268_v8, %v797_v54  ;;  %1111 = vadd.xlane.f32.xlu1 %v1110_v20  ;;  %v1068_v50 = vadd.f32 %v2459_v1, %v2453_v0  ;;  %v2954_v8 = vld [vmem:[#allocation5_spill] sm:$0xff] }
 0x19a   : > { %1706 = vpow2.f32 %v1023_v23  ;;  %v2467_v45 = vpop.eup %1682  ;;  %v1025_v47 = vmul.f32 1.442695, %v911_v28  ;;  %v1027_v56 = vmul.f32 1.442695, %v912_v36  ;;  %v2958_v36 = vld [vmem:[#allocation8_spill] sm:$0xff] }
 0x19b   : > { %1708 = vpow2.f32 %v961_v37  ;;  %v965_v6 = vmul.f32 1.442695, %v881_v30  ;;  %v2469_v3 = vpop.eup %1684  ;;  %v967_v29 = vmul.f32 1.442695, %v882_v38  ;;  %1114 = vadd.xlane.f32.xlu0 %v1113_v35  ;;  %v800_v49 = vpop.xlane.xlu1 %799  ;;  %v1116_v20 = vadd.f32 %v2467_v45, %v2464_v33  ;;  %v2959_v38 = vld [vmem:[#allocation10_spill] sm:$0xff] }
 0x19c   : > { %1710 = vpow2.f32 %v963_v17  ;;  %v845_v48 = vpop.xlane.xlu0 %844  ;;  %v2473_v58 = vpop.eup %1686  ;;  %v883_v14 = vsub.f32 %v2956_v51, %v800_v49  ;;  %v884_v43 = vsub.f32 %v2957_v7, %v800_v49 }
 0x19d   : > { %1712 = vpow2.f32 %v1025_v47  ;;  %v913_v2 = vsub.f32 %v2954_v8, %v845_v48  ;;  %v914_v39 = vsub.f32 %v2955_v9, %v845_v48  ;;  %v1071_v60 = vadd.f32 %v2473_v58, %v2469_v3  ;;  %1069 = vadd.xlane.f32.xlu1 %v1068_v50  ;;  %v2961_v48 = vld [vmem:[#allocation13_spill] sm:$0xff] }
 0x19e   : > { %v2478_v59 = vpop.eup %1688  ;;  %1714 = vpow2.f32 %v1027_v56  ;;  %v969_v23 = vmul.f32 1.442695, %v883_v14  ;;  %v971_v17 = vmul.f32 1.442695, %v884_v43  ;;  %v2960_v56 = vld [vmem:[#allocation11_spill] sm:$0xff] }
 0x19f   : > { %v2483_v11 = vpop.eup %1690  ;;  %1716 = vpow2.f32 %v965_v6  ;;  %v1029_v13 = vmul.f32 1.442695, %v913_v2  ;;  %v1031_v21 = vmul.f32 1.442695, %v914_v39  ;;  %1072 = vadd.xlane.f32.xlu0 %v1071_v60  ;;  %v848_v22 = vpop.xlane.xlu1 %847 }
 0x1a0   : > { %v2485_v37 = vpop.eup %1692  ;;  %1718 = vpow2.f32 %v967_v29  ;;  %v803_v54 = vpop.xlane.xlu0 %802  ;;  %v1119_v35 = vadd.f32 %v2483_v11, %v2478_v59  ;;  %v915_v30 = vsub.f32 %v2958_v36, %v848_v22  ;;  %v916_v47 = vsub.f32 %v2959_v38, %v848_v22  ;;  %v2963_v22 = vld [vmem:[#allocation14_spill] sm:$0xff] }
 0x1a1   : > { %v2491_v28 = vpop.eup %1694  ;;  %1720 = vpow2.f32 %v1029_v13  ;;  %v885_v6 = vsub.f32 %v2960_v56, %v803_v54  ;;  %v886_v49 = vsub.f32 %v2961_v48, %v803_v54  ;;  %1117 = vadd.xlane.f32.xlu1 %v1116_v20  ;;  %v2962_v13 = vld [vmem:[#allocation12_spill] sm:$0xff]  ;;  %v2964_v54 = vld [vmem:[#allocation15_spill] sm:$0xff] }
 0x1a2   : > { %v2496_v29 = vpop.eup %1696  ;;  %1722 = vpow2.f32 %v1031_v21  ;;  %v1033_v8 = vmul.f32 1.442695, %v915_v30  ;;  %v1035_v2 = vmul.f32 1.442695, %v916_v47  ;;  %v1074_v43 = vadd.f32 %v2491_v28, %v2485_v37 }
 0x1a3   : > { %v2499_v50 = vpop.eup %1698  ;;  %1724 = vpow2.f32 %v969_v23  ;;  %v973_v9 = vmul.f32 1.442695, %v885_v6  ;;  %v975_v51 = vmul.f32 1.442695, %v886_v49  ;;  %1120 = vadd.xlane.f32.xlu0 %v1119_v35  ;;  %v806_v7 = vpop.xlane.xlu1 %805 }
 0x1a4   : > { %v2501_v39 = vpop.eup %1700  ;;  %1726 = vpow2.f32 %v971_v17  ;;  %v851_v14 = vpop.xlane.xlu0 %850  ;;  %v887_v20 = vsub.f32 %v2964_v54, %v806_v7  ;;  %v2965_v17 = vld [vmem:[#allocation16_spill] sm:$0xff] }
 0x1a5   : > { %v2505_v60 = vpop.eup %1702  ;;  %1728 = vpow2.f32 %v1033_v8  ;;  %v917_v21 = vsub.f32 %v2962_v13, %v851_v14  ;;  %v918_v23 = vsub.f32 %v2963_v22, %v851_v14  ;;  %v888_v30 = vsub.f32 %v2965_v17, %v806_v7  ;;  %1075 = vadd.xlane.f32.xlu1 %v1074_v43 }
 0x1a6   : > { %v2510_v36 = vpop.eup %1704  ;;  %1730 = vpow2.f32 %v1035_v2  ;;  %v1077_v35 = vadd.f32 %v2505_v60, %v2501_v39  ;;  %v977_v6 = vmul.f32 1.442695, %v887_v20  ;;  %v1122_v7 = vadd.f32 %v2499_v50, %v2496_v29 }
 0x1a7   : > { %v2515_v38 = vpop.eup %1706  ;;  %1732 = vpow2.f32 %v973_v9  ;;  %v1037_v47 = vmul.f32 1.442695, %v917_v21  ;;  %v1039_v56 = vmul.f32 1.442695, %v918_v23  ;;  %v979_v49 = vmul.f32 1.442695, %v888_v30  ;;  %v854_v8 = vpop.xlane.xlu1 %853 }
 0x1a8   : > { %v2517_v48 = vpop.eup %1708  ;;  %1734 = vpow2.f32 %v975_v51  ;;  %1078 = vadd.xlane.f32.xlu0 %v1077_v35  ;;  %v809_v14 = vpop.xlane.xlu0 %808  ;;  %v1125_v2 = vadd.f32 %v2515_v38, %v2510_v36  ;;  %v919_v9 = vsub.f32 %v2313_v61, %v854_v8  ;;  %v920_v13 = vsub.f32 %v2321_v40, %v854_v8 }
 0x1a9   : > { %v2523_v43 = vpop.eup %1710  ;;  %1736 = vpow2.f32 %v1037_v47  ;;  %v889_v21 = vsub.f32 %v2324_v41, %v809_v14  ;;  %v890_v22 = vsub.f32 %v2332_v32, %v809_v14  ;;  %1123 = vadd.xlane.f32.xlu1 %v1122_v7 }
 0x1aa   : > { %v2528_v51 = vpop.eup %1712  ;;  %1738 = vpow2.f32 %v1039_v56  ;;  %v1041_v54 = vmul.f32 1.442695, %v919_v9  ;;  %v1043_v20 = vmul.f32 1.442695, %v920_v13  ;;  %v1080_v41 = vadd.f32 %v2523_v43, %v2517_v48 }
 0x1ab   : > { %v2531_v23 = vpop.eup %1714  ;;  %1740 = vpow2.f32 %v977_v6  ;;  %v981_v17 = vmul.f32 1.442695, %v889_v21  ;;  %v983_v61 = vmul.f32 1.442695, %v890_v22  ;;  %v812_v35 = vpop.xlane.xlu1 %811 }
 0x1ac   : > { %v2533_v30 = vpop.eup %1716  ;;  %1742 = vpow2.f32 %v979_v49  ;;  %1126 = vadd.xlane.f32.xlu0 %v1125_v2  ;;  %v857_v40 = vpop.xlane.xlu0 %856  ;;  %v891_v6 = vsub.f32 %v2340_v34, %v812_v35  ;;  %v2967_v49 = vld [vmem:[#allocation17_spill] sm:$0xff] }
 0x1ad   : > { %v2537_v47 = vpop.eup %1718  ;;  %1744 = vpow2.f32 %v1041_v54  ;;  %v921_v32 = vsub.f32 %v2329_v27, %v857_v40  ;;  %v922_v56 = vsub.f32 %v2337_v15, %v857_v40  ;;  %v892_v14 = vsub.f32 %v2967_v49, %v812_v35  ;;  %1081 = vadd.xlane.f32.xlu1 %v1080_v41  ;;  %v2971_v40 = vld [vmem:[#allocation18_spill] sm:$0xff]  ;;  %v2972_v35 = vld [vmem:[#allocation19_spill] sm:$0xff] }
 0x1ae   : > { %v2542_v8 = vpop.eup %1720  ;;  %1746 = vpow2.f32 %v1043_v20  ;;  %v1083_v2 = vadd.f32 %v2537_v47, %v2533_v30  ;;  %v985_v21 = vmul.f32 1.442695, %v891_v6  ;;  %v1128_v54 = vadd.f32 %v2531_v23, %v2528_v51 }
 0x1af   : > { %2966 = vst [vmem:[#allocation5_spill] sm:$0xff] %v2542_v8  ;;  %v2547_v7 = vpop.eup %1722  ;;  %1748 = vpow2.f32 %v981_v17  ;;  %v1045_v9 = vmul.f32 1.442695, %v921_v32  ;;  %v1047_v13 = vmul.f32 1.442695, %v922_v56  ;;  %v860_v34 = vpop.xlane.xlu1 %859 }
 0x1b0   : > { %2968 = vst [vmem:[#allocation6_spill] sm:$0xff] %v2547_v7  ;;  %v2549_v27 = vpop.eup %1724  ;;  %1750 = vpow2.f32 %v983_v61  ;;  %v987_v15 = vmul.f32 1.442695, %v892_v14  ;;  %1084 = vadd.xlane.f32.xlu0 %v1083_v2  ;;  %v1131_v22 = vadd.f32 %v2547_v7, %v2542_v8  ;;  %v923_v17 = vsub.f32 %v2971_v40, %v860_v34 }
 0x1b1   : > { %2969 = vst [vmem:[#allocation7_spill] sm:$0xff] %v2549_v27  ;;  %v2555_v20 = vpop.eup %1726  ;;  %1752 = vpow2.f32 %v1045_v9  ;;  %v924_v41 = vsub.f32 %v2972_v35, %v860_v34  ;;  %1129 = vadd.xlane.f32.xlu1 %v1128_v54 }
 0x1b2   : > { %2970 = vst [vmem:[#allocation9_spill] sm:$0xff] %v2555_v20  ;;  %v2559_v32 = vpop.eup %1728  ;;  %1754 = vpow2.f32 %v1047_v13  ;;  %v1049_v56 = vmul.f32 1.442695, %v923_v17  ;;  %v1086_v14 = vadd.f32 %v2555_v20, %v2549_v27 }
 0x1b3   : > { %2973 = vst [vmem:[#allocation8_spill] sm:$0xff] %v2559_v32  ;;  %v2561_v61 = vpop.eup %1730  ;;  %1756 = vpow2.f32 %v985_v21  ;;  %v1051_v49 = vmul.f32 1.442695, %v924_v41 }
 0x1b4   : > { %2974 = vst [vmem:[#allocation10_spill] sm:$0xff] %v2561_v61  ;;  %v2563_v6 = vpop.eup %1732  ;;  %1758 = vpow2.f32 %v987_v15  ;;  %1132 = vadd.xlane.f32.xlu0 %v1131_v22  ;;  %v1134_v22 = vadd.f32 %v2561_v61, %v2559_v32 }
 0x1b5   : > { %2975 = vst [vmem:[#allocation11_spill] sm:$0xff] %v2563_v6  ;;  %v2567_v2 = vpop.eup %1734  ;;  %1087 = vadd.xlane.f32.xlu1 %v1086_v14  ;;  %1760 = vpow2.f32 %v1049_v56 }
 0x1b6   : > { %2976 = vst [vmem:[#allocation13_spill] sm:$0xff] %v2567_v2  ;;  %v2569_v9 = vpop.eup %1736  ;;  %v1089_v13 = vadd.f32 %v2567_v2, %v2563_v6  ;;  %1762 = vpow2.f32 %v1051_v49 }
 0x1b7   : > { %2977 = vst [vmem:[#allocation12_spill] sm:$0xff] %v2569_v9  ;;  %v2573_v34 = vpop.eup %1738 }
 0x1b8   : > { %2978 = vst [vmem:[#allocation14_spill] sm:$0xff] %v2573_v34  ;;  %v2575_v21 = vpop.eup %1740  ;;  %1090 = vadd.xlane.f32.xlu0 %v1089_v13  ;;  %v1137_v15 = vadd.f32 %v2573_v34, %v2569_v9 }
 0x1b9   : > { %2979 = vst [vmem:[#allocation15_spill] sm:$0xff] %v2575_v21  ;;  %v2581_v54 = vpop.eup %1742  ;;  %1135 = vadd.xlane.f32.xlu1 %v1134_v22 }
 0x1ba   : > { %2980 = vst [vmem:[#allocation16_spill] sm:$0xff] %v2581_v54  ;;  %v2583_v40 = vpop.eup %1744  ;;  %v1092_v41 = vadd.f32 %v2581_v54, %v2575_v21 }
 0x1bb   : > { %2981 = vst [vmem:[#allocation17_spill] sm:$0xff] %v2583_v40  ;;  %v2585_v17 = vpop.eup %1746 }
 0x1bc   : > { %2982 = vst [vmem:[#allocation18_spill] sm:$0xff] %v2585_v17  ;;  %v2587_v35 = vpop.eup %1748  ;;  %1138 = vadd.xlane.f32.xlu0 %v1137_v15  ;;  %v1140_v15 = vadd.f32 %v2585_v17, %v2583_v40 }
 0x1bd   : > { %2983 = vst [vmem:[#allocation19_spill] sm:$0xff] %v2587_v35  ;;  %v2591_v56 = vpop.eup %1750  ;;  %1093 = vadd.xlane.f32.xlu1 %v1092_v41 }
 0x1be   : > { %2984 = vst [vmem:[#allocation20_spill] sm:$0xff] %v2591_v56  ;;  %v2593_v49 = vpop.eup %1752  ;;  %v1095_v14 = vadd.f32 %v2591_v56, %v2587_v35 }
 0x1bf   : > { %2985 = vst [vmem:[#allocation21_spill] sm:$0xff] %v2593_v49  ;;  %v2597_v13 = vpop.eup %1754 }
 0x1c0   : > { %2986 = vst [vmem:[#allocation22_spill] sm:$0xff] %v2597_v13  ;;  %v2599_v34 = vpop.eup %1756  ;;  %1096 = vadd.xlane.f32.xlu0 %v1095_v14  ;;  %v1143_v22 = vadd.f32 %v2597_v13, %v2593_v49 }
 0x1c1   : > { %2987 = vst [vmem:[#allocation23_spill] sm:$0xff] %v2599_v34  ;;  %v2605_v54 = vpop.eup %1758  ;;  %1141 = vadd.xlane.f32.xlu1 %v1140_v15 }
 0x1c2   : > { %2988 = vst [vmem:[#allocation24_spill] sm:$0xff] %v2605_v54  ;;  %v2607_v21 = vpop.eup %1760  ;;  %v1098_v41 = vadd.f32 %v2605_v54, %v2599_v34 }
 0x1c3   : > { %2989 = vst [vmem:[#allocation25_spill] sm:$0xff] %v2607_v21  ;;  %v2611_v56 = vpop.eup %1762 }
 0x1c4   : > { %1144 = vadd.xlane.f32.xlu0 %v1143_v22  ;;  %2990 = vst [vmem:[#allocation26_spill] sm:$0xff] %v2611_v56  ;;  %v1146_v14 = vadd.f32 %v2611_v56, %v2607_v21 }
 0x1c5   : > { %1099 = vadd.xlane.f32.xlu1 %v1098_v41 }
 0x1c9   : > { %1147 = vadd.xlane.f32.xlu1 %v1146_v14 }
 0x20e   : > { %v1055_v13 = vpop.xlane.xlu0 %1054 }
 0x20f   : > { %1764 = vrcp.f32 %v1055_v13 }
 0x214   : > { %v1103_v49 = vpop.xlane.xlu0 %1102 }
 0x215   : > { %1766 = vrcp.f32 %v1103_v49 }
 0x216   : > { %v1058_v15 = vpop.xlane.xlu1 %1057 }
 0x217   : > { %1768 = vrcp.f32 %v1058_v15 }
 0x218   : > { %v1061_v17 = vpop.xlane.xlu0 %1060 }
 0x219   : > { %1770 = vrcp.f32 %v1061_v17 }
 0x21a   : > { %v1106_v22 = vpop.xlane.xlu1 %1105 }
 0x21b   : > { %1772 = vrcp.f32 %v1106_v22 }
 0x21c   : > { %v1765_v54 = vpop.eup %1764  ;;  %v1109_v34 = vpop.xlane.xlu0 %1108 }
 0x21d   : > { %v1181_v40 = vmul.f32 %v1765_v54, %v1055_v13  ;;  %1774 = vrcp.f32 %v1109_v34 }
 0x21e   : > { %v1064_v41 = vpop.xlane.xlu1 %1063 }
 0x21f   : > { %v1213_v14 = vsub.f32 2.0, %v1181_v40  ;;  %1776 = vrcp.f32 %v1064_v41 }
 0x220   : > { %v1067_v56 = vpop.xlane.xlu0 %1066 }
 0x221   : > { %v1245_v21 = vmul.f32 %v1765_v54, %v1213_v14  ;;  %1778 = vrcp.f32 %v1067_v56 }
 0x222   : > { %v1767_v35 = vpop.eup %1766  ;;  %v2618_v9 = vpop.xlane.xlu1 %1111 }
 0x223   : > { %v1277_v61 = vmul.f32 %v2376_v63, %v1245_v21  ;;  %v1278_v32 = vmul.f32 %v2379_v31, %v1245_v21  ;;  %v1197_v2 = vmul.f32 %v1767_v35, %v1103_v49  ;;  %1780 = vrcp.f32 %v2618_v9 }
 0x224   : > { %v1769_v13 = vpop.eup %1768  ;;  %v2623_v6 = vpop.xlane.xlu0 %1114 }
 0x225   : > { %1341 = vst [vmem:[%s2625_s21] sm:$0xff] %v1277_v61  ;;  %1342 = vst [vmem:[%s2625_s21 + $0x8] sm:$0xff] %v1278_v32  ;;  %v1229_v54 = vsub.f32 2.0, %v1197_v2  ;;  %v1182_v40 = vmul.f32 %v1769_v13, %v1058_v15  ;;  %1782 = vrcp.f32 %v2623_v6 }
 0x226   : > { %v1771_v14 = vpop.eup %1770  ;;  %v2630_v63 = vpop.xlane.xlu1 %1069 }
 0x227   : > { %v1261_v31 = vmul.f32 %v1767_v35, %v1229_v54  ;;  %v1183_v21 = vmul.f32 %v1771_v14, %v1061_v17  ;;  %v1214_v49 = vsub.f32 2.0, %v1182_v40  ;;  %1784 = vrcp.f32 %v2630_v63 }
 0x228   : > { %v1773_v20 = vpop.eup %1772  ;;  %v2633_v27 = vpop.xlane.xlu0 %1072 }
 0x229   : > { %v1309_v61 = vmul.f32 %v2391_v46, %v1261_v31  ;;  %v1310_v32 = vmul.f32 %v2393_v5, %v1261_v31  ;;  %v1215_v2 = vsub.f32 2.0, %v1183_v21  ;;  %v1246_v15 = vmul.f32 %v1769_v13, %v1214_v49 }
 0x22a   : > { %v1775_v7 = vpop.eup %1774  ;;  %v1198_v8 = vmul.f32 %v1773_v20, %v1106_v22  ;;  %1786 = vrcp.f32 %v2633_v27  ;;  %v2638_v35 = vpop.xlane.xlu1 %1117 }
 0x22b   : > { %1373 = vst [vmem:[%s2625_s21 + $0x100] sm:$0xff] %v1309_v61  ;;  %1374 = vst [vmem:[%s2625_s21 + $0x108] sm:$0xff] %v1310_v32  ;;  %v1247_v17 = vmul.f32 %v1771_v14, %v1215_v2  ;;  %v1279_v54 = vmul.f32 %v2398_v10, %v1246_v15  ;;  %v1280_v40 = vmul.f32 %v2403_v25, %v1246_v15  ;;  %1788 = vrcp.f32 %v2638_v35 }
 0x22c   : > { %v1199_v46 = vmul.f32 %v1775_v7, %v1109_v34  ;;  %v1777_v5 = vpop.eup %1776  ;;  %v1230_v13 = vsub.f32 2.0, %v1198_v8  ;;  %v2644_v31 = vpop.xlane.xlu0 %1120 }
 0x22d   : > { %v1281_v22 = vmul.f32 %v2405_v12, %v1247_v17  ;;  %v1282_v21 = vmul.f32 %v2409_v24, %v1247_v17  ;;  %1343 = vst [vmem:[%s2625_s21 + $0x10] sm:$0xff] %v1279_v54  ;;  %1344 = vst [vmem:[%s2625_s21 + $0x18] sm:$0xff] %v1280_v40  ;;  %v1184_v49 = vmul.f32 %v1777_v5, %v1064_v41  ;;  %1790 = vrcp.f32 %v2644_v31 }
 0x22e   : > { %v1231_v14 = vsub.f32 2.0, %v1199_v46  ;;  %v1779_v10 = vpop.eup %1778  ;;  %v1262_v61 = vmul.f32 %v1773_v20, %v1230_v13  ;;  %v2652_v25 = vpop.xlane.xlu1 %1075 }
 0x22f   : > { %1345 = vst [vmem:[%s2625_s21 + $0x20] sm:$0xff] %v1281_v22  ;;  %1346 = vst [vmem:[%s2625_s21 + $0x28] sm:$0xff] %v1282_v21  ;;  %v1185_v34 = vmul.f32 %v1779_v10, %v1067_v56  ;;  %v1216_v32 = vsub.f32 2.0, %v1184_v49  ;;  %1792 = vrcp.f32 %v2652_v25 }
 0x230   : > { %v1263_v8 = vmul.f32 %v1775_v7, %v1231_v14  ;;  %v1781_v12 = vpop.eup %1780  ;;  %v1311_v24 = vmul.f32 %v2386_v4, %v1262_v61  ;;  %v1312_v20 = vmul.f32 %v2389_v26, %v1262_v61 }
 0x231   : > { %v2659_v41 = vpop.xlane.xlu0 %1078  ;;  %v1217_v17 = vsub.f32 2.0, %v1185_v34  ;;  %v1248_v54 = vmul.f32 %v1777_v5, %v1216_v32  ;;  %v1200_v56 = vmul.f32 %v1781_v12, %v2618_v9 }
 0x232   : > { %v1313_v2 = vmul.f32 %v2414_v53, %v1263_v8  ;;  %v1314_v15 = vmul.f32 %v2419_v42, %v1263_v8  ;;  %v1783_v7 = vpop.eup %1782  ;;  %1375 = vst [vmem:[%s2625_s21 + $0x110] sm:$0xff] %v1311_v24  ;;  %1376 = vst [vmem:[%s2625_s21 + $0x118] sm:$0xff] %v1312_v20  ;;  %1794 = vrcp.f32 %v2659_v41  ;;  %v2667_v4 = vpop.xlane.xlu1 %1123 }
 0x233   : > { %v1249_v26 = vmul.f32 %v1779_v10, %v1217_v17  ;;  %v1283_v53 = vmul.f32 %v2421_v19, %v1248_v54  ;;  %v1284_v42 = vmul.f32 %v2427_v55, %v1248_v54  ;;  %v1201_v40 = vmul.f32 %v1783_v7, %v2623_v6 }
 0x234   : > { %1377 = vst [vmem:[%s2625_s21 + $0x120] sm:$0xff] %v1313_v2  ;;  %1378 = vst [vmem:[%s2625_s21 + $0x128] sm:$0xff] %v1314_v15  ;;  %v1785_v46 = vpop.eup %1784  ;;  %v1232_v5 = vsub.f32 2.0, %v1200_v56  ;;  %1796 = vrcp.f32 %v2667_v4 }
 0x235   : > { %v2674_v13 = vpop.xlane.xlu0 %1126  ;;  %v1285_v9 = vmul.f32 %v2437_v16, %v1249_v26  ;;  %v1286_v22 = vmul.f32 %v2441_v57, %v1249_v26  ;;  %1347 = vst [vmem:[%s2625_s21 + $0x30] sm:$0xff] %v1283_v53  ;;  %1348 = vst [vmem:[%s2625_s21 + $0x38] sm:$0xff] %v1284_v42  ;;  %v1233_v21 = vsub.f32 2.0, %v1201_v40  ;;  %v1186_v19 = vmul.f32 %v1785_v46, %v2630_v63 }
 0x236   : > { %v1264_v55 = vmul.f32 %v1781_v12, %v1232_v5  ;;  %1798 = vrcp.f32 %v2674_v13  ;;  %v2683_v6 = vpop.xlane.xlu1 %1081 }
 0x237   : > { %v1787_v14 = vpop.eup %1786  ;;  %1349 = vst [vmem:[%s2625_s21 + $0x40] sm:$0xff] %v1285_v9  ;;  %1350 = vst [vmem:[%s2625_s21 + $0x48] sm:$0xff] %v1286_v22  ;;  %v1265_v49 = vmul.f32 %v1783_v7, %v1233_v21  ;;  %v1218_v10 = vsub.f32 2.0, %v1186_v19  ;;  %1800 = vrcp.f32 %v2683_v6 }
 0x238   : > { %v1315_v16 = vmul.f32 %v2432_v44, %v1264_v55  ;;  %v1316_v57 = vmul.f32 %v2435_v52, %v1264_v55  ;;  %v1187_v63 = vmul.f32 %v1787_v14, %v2633_v27  ;;  %v1789_v8 = vpop.eup %1788 }
 0x239   : > { %v2691_v61 = vpop.xlane.xlu0 %1084  ;;  %v1317_v34 = vmul.f32 %v2446_v62, %v1265_v49  ;;  %v1318_v32 = vmul.f32 %v2451_v18, %v1265_v49  ;;  %v1250_v12 = vmul.f32 %v1785_v46, %v1218_v10  ;;  %v1202_v24 = vmul.f32 %v1789_v8, %v2638_v35 }
 0x23a   : > { %1802 = vrcp.f32 %v2691_v61  ;;  %1379 = vst [vmem:[%s2625_s21 + $0x130] sm:$0xff] %v1315_v16  ;;  %1380 = vst [vmem:[%s2625_s21 + $0x138] sm:$0xff] %v1316_v57  ;;  %v1219_v44 = vsub.f32 2.0, %v1187_v63  ;;  %v2699_v52 = vpop.xlane.xlu1 %1129  ;;  %v1791_v27 = vpop.eup %1790 }
 0x23b   : > { %1381 = vst [vmem:[%s2625_s21 + $0x140] sm:$0xff] %v1317_v34  ;;  %1382 = vst [vmem:[%s2625_s21 + $0x148] sm:$0xff] %v1318_v32  ;;  %v1287_v20 = vmul.f32 %v2453_v0, %v1250_v12  ;;  %v1288_v62 = vmul.f32 %v2459_v1, %v1250_v12  ;;  %1804 = vrcp.f32 %v2699_v52  ;;  %v1203_v15 = vmul.f32 %v1791_v27, %v2644_v31 }
 0x23c   : > { %v1793_v18 = vpop.eup %1792  ;;  %v1251_v2 = vmul.f32 %v1787_v14, %v1219_v44  ;;  %v1234_v17 = vsub.f32 2.0, %v1202_v24 }
 0x23d   : > { %v2707_v54 = vpop.xlane.xlu0 %1132  ;;  %1351 = vst [vmem:[%s2625_s21 + $0x50] sm:$0xff] %v1287_v20  ;;  %1352 = vst [vmem:[%s2625_s21 + $0x58] sm:$0xff] %v1288_v62  ;;  %v1188_v35 = vmul.f32 %v1793_v18, %v2652_v25  ;;  %v1235_v7 = vsub.f32 2.0, %v1203_v15 }
 0x23e   : > { %1806 = vrcp.f32 %v2707_v54  ;;  %v1289_v0 = vmul.f32 %v2469_v3, %v1251_v2  ;;  %v1290_v1 = vmul.f32 %v2473_v58, %v1251_v2  ;;  %v1266_v56 = vmul.f32 %v1789_v8, %v1234_v17  ;;  %v2715_v26 = vpop.xlane.xlu1 %1087 }
 0x23f   : > { %v1795_v31 = vpop.eup %1794  ;;  %v1220_v53 = vsub.f32 2.0, %v1188_v35  ;;  %1808 = vrcp.f32 %v2715_v26  ;;  %v1267_v42 = vmul.f32 %v1791_v27, %v1235_v7 }
 0x240   : > { %1353 = vst [vmem:[%s2625_s21 + $0x60] sm:$0xff] %v1289_v0  ;;  %1354 = vst [vmem:[%s2625_s21 + $0x68] sm:$0xff] %v1290_v1  ;;  %v1319_v25 = vmul.f32 %v2464_v33, %v1266_v56  ;;  %v1320_v40 = vmul.f32 %v2467_v45, %v1266_v56  ;;  %v1189_v3 = vmul.f32 %v1795_v31, %v2659_v41 }
 0x241   : > { %v2723_v58 = vpop.xlane.xlu0 %1090  ;;  %v1797_v46 = vpop.eup %1796  ;;  %v1252_v5 = vmul.f32 %v1793_v18, %v1220_v53  ;;  %v1321_v9 = vmul.f32 %v2478_v59, %v1267_v42  ;;  %v1322_v22 = vmul.f32 %v2483_v11, %v1267_v42  ;;  %v2991_v53 = vld [vmem:[#allocation5_spill] sm:$0xff] }
 0x242   : > { %1810 = vrcp.f32 %v2723_v58  ;;  %1383 = vst [vmem:[%s2625_s21 + $0x150] sm:$0xff] %v1319_v25  ;;  %1384 = vst [vmem:[%s2625_s21 + $0x158] sm:$0xff] %v1320_v40  ;;  %v1221_v33 = vsub.f32 2.0, %v1189_v3  ;;  %v1204_v45 = vmul.f32 %v1797_v46, %v2667_v4  ;;  %v2731_v41 = vpop.xlane.xlu1 %1135  ;;  %v2992_v25 = vld [vmem:[#allocation6_spill] sm:$0xff] }
 0x243   : > { %v1799_v21 = vpop.eup %1798  ;;  %v1291_v19 = vmul.f32 %v2485_v37, %v1252_v5  ;;  %v1292_v55 = vmul.f32 %v2491_v28, %v1252_v5  ;;  %1812 = vrcp.f32 %v2731_v41  ;;  %1385 = vst [vmem:[%s2625_s21 + $0x160] sm:$0xff] %v1321_v9  ;;  %1386 = vst [vmem:[%s2625_s21 + $0x168] sm:$0xff] %v1322_v22  ;;  %v2993_v22 = vld [vmem:[#allocation7_spill] sm:$0xff] }
 0x244   : > { %v1801_v14 = vpop.eup %1800  ;;  %v1253_v59 = vmul.f32 %v1795_v31, %v1221_v33  ;;  %v1205_v11 = vmul.f32 %v1799_v21, %v2674_v13  ;;  %v1236_v49 = vsub.f32 2.0, %v1204_v45  ;;  %v2994_v33 = vld [vmem:[#allocation9_spill] sm:$0xff] }
 0x245   : > { %v2739_v10 = vpop.xlane.xlu0 %1138  ;;  %1355 = vst [vmem:[%s2625_s21 + $0x70] sm:$0xff] %v1291_v19  ;;  %1356 = vst [vmem:[%s2625_s21 + $0x78] sm:$0xff] %v1292_v55  ;;  %v1190_v4 = vmul.f32 %v1801_v14, %v2683_v6 }
 0x246   : > { %1814 = vrcp.f32 %v2739_v10  ;;  %v1293_v28 = vmul.f32 %v2501_v39, %v1253_v59  ;;  %v1294_v16 = vmul.f32 %v2505_v60, %v1253_v59  ;;  %v1237_v57 = vsub.f32 2.0, %v1205_v11  ;;  %v2747_v8 = vpop.xlane.xlu1 %1093  ;;  %v2996_v11 = vld [vmem:[#allocation13_spill] sm:$0xff] }
 0x247   : > { %v1803_v37 = vpop.eup %1802  ;;  %v1268_v63 = vmul.f32 %v1797_v46, %v1236_v49  ;;  %v1222_v34 = vsub.f32 2.0, %v1190_v4  ;;  %1816 = vrcp.f32 %v2747_v8 }
 0x248   : > { %v1191_v13 = vmul.f32 %v1803_v37, %v2691_v61  ;;  %v1805_v32 = vpop.eup %1804  ;;  %1357 = vst [vmem:[%s2625_s21 + $0x80] sm:$0xff] %v1293_v28  ;;  %1358 = vst [vmem:[%s2625_s21 + $0x88] sm:$0xff] %v1294_v16  ;;  %v1269_v6 = vmul.f32 %v1799_v21, %v1237_v57 }
 0x249   : > { %v1323_v12 = vmul.f32 %v2496_v29, %v1268_v63  ;;  %v1324_v39 = vmul.f32 %v2499_v50, %v1268_v63  ;;  %v2755_v60 = vpop.xlane.xlu0 %1096  ;;  %v1254_v24 = vmul.f32 %v1801_v14, %v1222_v34  ;;  %v1206_v61 = vmul.f32 %v1805_v32, %v2699_v52  ;;  %v2995_v14 = vld [vmem:[#allocation11_spill] sm:$0xff]  ;;  %v2997_v63 = vld [vmem:[#allocation8_spill] sm:$0xff]  ;;  %v2998_v34 = vld [vmem:[#allocation10_spill] sm:$0xff] }
 0x24a   : > { %v1223_v44 = vsub.f32 2.0, %v1191_v13  ;;  %1818 = vrcp.f32 %v2755_v60  ;;  %v1325_v20 = vmul.f32 %v2510_v36, %v1269_v6  ;;  %v1326_v62 = vmul.f32 %v2515_v38, %v1269_v6  ;;  %v2763_v29 = vpop.xlane.xlu1 %1141 }
 0x24b   : > { %v1807_v27 = vpop.eup %1806  ;;  %1387 = vst [vmem:[%s2625_s21 + $0x170] sm:$0xff] %v1323_v12  ;;  %1388 = vst [vmem:[%s2625_s21 + $0x178] sm:$0xff] %v1324_v39  ;;  %v1295_v18 = vmul.f32 %v2517_v48, %v1254_v24  ;;  %v1296_v2 = vmul.f32 %v2523_v43, %v1254_v24  ;;  %v1238_v36 = vsub.f32 2.0, %v1206_v61  ;;  %1820 = vrcp.f32 %v2763_v29  ;;  %v2999_v12 = vld [vmem:[#allocation12_spill] sm:$0xff] }
 0x24c   : > { %v1255_v50 = vmul.f32 %v1803_v37, %v1223_v44  ;;  %v1207_v52 = vmul.f32 %v1807_v27, %v2707_v54  ;;  %v1809_v15 = vpop.eup %1808  ;;  %1389 = vst [vmem:[%s2625_s21 + $0x180] sm:$0xff] %v1325_v20  ;;  %1390 = vst [vmem:[%s2625_s21 + $0x188] sm:$0xff] %v1326_v62  ;;  %v3000_v44 = vld [vmem:[#allocation14_spill] sm:$0xff]  ;;  %v3001_v62 = vld [vmem:[#allocation15_spill] sm:$0xff] }
 0x24d   : > { %v2770_v38 = vpop.xlane.xlu0 %1144  ;;  %1359 = vst [vmem:[%s2625_s21 + $0x90] sm:$0xff] %v1295_v18  ;;  %1360 = vst [vmem:[%s2625_s21 + $0x98] sm:$0xff] %v1296_v2  ;;  %v1192_v43 = vmul.f32 %v1809_v15, %v2715_v26  ;;  %v1270_v0 = vmul.f32 %v1805_v32, %v1238_v36  ;;  %v3002_v18 = vld [vmem:[#allocation16_spill] sm:$0xff] }
 0x24e   : > { %v1297_v17 = vmul.f32 %v2533_v30, %v1255_v50  ;;  %v1298_v35 = vmul.f32 %v2537_v47, %v1255_v50  ;;  %v1239_v48 = vsub.f32 2.0, %v1207_v52  ;;  %1822 = vrcp.f32 %v2770_v38  ;;  %v2779_v1 = vpop.xlane.xlu1 %1099 }
 0x24f   : > { %v1811_v54 = vpop.eup %1810  ;;  %v1224_v47 = vsub.f32 2.0, %v1192_v43  ;;  %1824 = vrcp.f32 %v2779_v1  ;;  %v1327_v26 = vmul.f32 %v2528_v51, %v1270_v0  ;;  %v1328_v31 = vmul.f32 %v2531_v23, %v1270_v0 }
 0x250   : > { %1361 = vst [vmem:[%s2625_s21 + $0xa0] sm:$0xff] %v1297_v17  ;;  %1362 = vst [vmem:[%s2625_s21 + $0xa8] sm:$0xff] %v1298_v35  ;;  %v1271_v7 = vmul.f32 %v1807_v27, %v1239_v48  ;;  %v1193_v30 = vmul.f32 %v1811_v54, %v2723_v58  ;;  %v1813_v56 = vpop.eup %1812  ;;  %v3003_v17 = vld [vmem:[#allocation19_spill] sm:$0xff]  ;;  %v3004_v48 = vld [vmem:[#allocation20_spill] sm:$0xff] }
 0x251   : > { %v1256_v46 = vmul.f32 %v1809_v15, %v1224_v47  ;;  %1391 = vst [vmem:[%s2625_s21 + $0x190] sm:$0xff] %v1327_v26  ;;  %1392 = vst [vmem:[%s2625_s21 + $0x198] sm:$0xff] %v1328_v31  ;;  %v1208_v58 = vmul.f32 %v1813_v56, %v2731_v41 }
 0x252   : > { %v1329_v42 = vmul.f32 %v2991_v53, %v1271_v7  ;;  %v1330_v40 = vmul.f32 %v2992_v25, %v1271_v7  ;;  %v1225_v3 = vsub.f32 2.0, %v1193_v30  ;;  %v1148_v9 = vpop.xlane.xlu1 %1147  ;;  %v3005_v30 = vld [vmem:[#allocation17_spill] sm:$0xff]  ;;  %v3008_v25 = vld [vmem:[#allocation22_spill] sm:$0xff] }
 0x253   : > { %v1815_v5 = vpop.eup %1814  ;;  %v1299_v23 = vmul.f32 %v2993_v22, %v1256_v46  ;;  %v1300_v45 = vmul.f32 %v2994_v33, %v1256_v46  ;;  %v1240_v55 = vsub.f32 2.0, %v1208_v58  ;;  %1826 = vrcp.f32 %v1148_v9  ;;  %v3009_v46 = vld [vmem:[#allocation23_spill] sm:$0xff]  ;;  %v3010_v58 = vld [vmem:[#allocation24_spill] sm:$0xff] }
 0x254   : > { %1393 = vst [vmem:[%s2625_s21 + $0x1a0] sm:$0xff] %v1329_v42  ;;  %1394 = vst [vmem:[%s2625_s21 + $0x1a8] sm:$0xff] %v1330_v40  ;;  %v1257_v51 = vmul.f32 %v1811_v54, %v1225_v3  ;;  %v1209_v21 = vmul.f32 %v1815_v5, %v2739_v10  ;;  %v1817_v19 = vpop.eup %1816  ;;  %v3007_v42 = vld [vmem:[#allocation21_spill] sm:$0xff] }
 0x255   : > { %1363 = vst [vmem:[%s2625_s21 + $0xb0] sm:$0xff] %v1299_v23  ;;  %1364 = vst [vmem:[%s2625_s21 + $0xb8] sm:$0xff] %v1300_v45  ;;  %v1194_v4 = vmul.f32 %v1817_v19, %v2747_v8  ;;  %v1272_v28 = vmul.f32 %v1813_v56, %v1240_v55  ;;  %v3006_v56 = vld [vmem:[#allocation18_spill] sm:$0xff] }
 0x256   : > { %v1301_v59 = vmul.f32 %v2995_v14, %v1257_v51  ;;  %v1302_v49 = vmul.f32 %v2996_v11, %v1257_v51  ;;  %v1241_v41 = vsub.f32 2.0, %v1209_v21  ;;  %v3012_v45 = vld [vmem:[#allocation26_spill] sm:$0xff] }
 0x257   : > { %v1819_v37 = vpop.eup %1818  ;;  %v1226_v57 = vsub.f32 2.0, %v1194_v4  ;;  %v1331_v13 = vmul.f32 %v2997_v63, %v1272_v28  ;;  %v1332_v32 = vmul.f32 %v2998_v34, %v1272_v28 }
 0x258   : > { %1365 = vst [vmem:[%s2625_s21 + $0xc0] sm:$0xff] %v1301_v59  ;;  %1366 = vst [vmem:[%s2625_s21 + $0xc8] sm:$0xff] %v1302_v49  ;;  %v1273_v10 = vmul.f32 %v1815_v5, %v1241_v41  ;;  %v1195_v16 = vmul.f32 %v1819_v37, %v2755_v60  ;;  %v1821_v6 = vpop.eup %1820 }
 0x259   : > { %v1258_v61 = vmul.f32 %v1817_v19, %v1226_v57  ;;  %1395 = vst [vmem:[%s2625_s21 + $0x1b0] sm:$0xff] %v1331_v13  ;;  %1396 = vst [vmem:[%s2625_s21 + $0x1b8] sm:$0xff] %v1332_v32  ;;  %v1210_v27 = vmul.f32 %v1821_v6, %v2763_v29 }
 0x25a   : > { %v1333_v39 = vmul.f32 %v2999_v12, %v1273_v10  ;;  %v1334_v8 = vmul.f32 %v3000_v44, %v1273_v10  ;;  %v1227_v24 = vsub.f32 2.0, %v1195_v16 }
 0x25b   : > { %v1823_v20 = vpop.eup %1822  ;;  %v1303_v50 = vmul.f32 %v3001_v62, %v1258_v61  ;;  %v1304_v2 = vmul.f32 %v3002_v18, %v1258_v61  ;;  %v1242_v36 = vsub.f32 2.0, %v1210_v27 }
 0x25c   : > { %1397 = vst [vmem:[%s2625_s21 + $0x1c0] sm:$0xff] %v1333_v39  ;;  %1398 = vst [vmem:[%s2625_s21 + $0x1c8] sm:$0xff] %v1334_v8  ;;  %v1259_v60 = vmul.f32 %v1819_v37, %v1227_v24  ;;  %v1825_v52 = vpop.eup %1824  ;;  %v1211_v15 = vmul.f32 %v1823_v20, %v2770_v38 }
 0x25d   : > { %1367 = vst [vmem:[%s2625_s21 + $0xd0] sm:$0xff] %v1303_v50  ;;  %1368 = vst [vmem:[%s2625_s21 + $0xd8] sm:$0xff] %v1304_v2  ;;  %v1196_v29 = vmul.f32 %v1825_v52, %v2779_v1  ;;  %v1274_v0 = vmul.f32 %v1821_v6, %v1242_v36 }
 0x25e   : > { %v1305_v35 = vmul.f32 %v3003_v17, %v1259_v60  ;;  %v1306_v43 = vmul.f32 %v3004_v48, %v1259_v60  ;;  %v1243_v54 = vsub.f32 2.0, %v1211_v15 }
 0x25f   : > { %v1228_v7 = vsub.f32 2.0, %v1196_v29  ;;  %v1335_v47 = vmul.f32 %v3005_v30, %v1274_v0  ;;  %v1336_v26 = vmul.f32 %v3006_v56, %v1274_v0 }
 0x260   : > { %1369 = vst [vmem:[%s2625_s21 + $0xe0] sm:$0xff] %v1305_v35  ;;  %1370 = vst [vmem:[%s2625_s21 + $0xe8] sm:$0xff] %v1306_v43  ;;  %v1275_v38 = vmul.f32 %v1823_v20, %v1243_v54  ;;  %v1827_v31 = vpop.eup %1826 }
 0x261   : > { %v1260_v53 = vmul.f32 %v1825_v52, %v1228_v7  ;;  %1399 = vst [vmem:[%s2625_s21 + $0x1d0] sm:$0xff] %v1335_v47  ;;  %1400 = vst [vmem:[%s2625_s21 + $0x1d8] sm:$0xff] %v1336_v26  ;;  %v1212_v3 = vmul.f32 %v1827_v31, %v1148_v9  ;;  %v3011_v9 = vld [vmem:[#allocation25_spill] sm:$0xff] }
 0x262   : > { %v1337_v1 = vmul.f32 %v3007_v42, %v1275_v38  ;;  %v1338_v40 = vmul.f32 %v3008_v25, %v1275_v38 }
 0x263   : > { %v1307_v5 = vmul.f32 %v3009_v46, %v1260_v53  ;;  %v1308_v51 = vmul.f32 %v3010_v58, %v1260_v53  ;;  %v1244_v22 = vsub.f32 2.0, %v1212_v3 }
 0x264   : > { %1401 = vst [vmem:[%s2625_s21 + $0x1e0] sm:$0xff] %v1337_v1  ;;  %1402 = vst [vmem:[%s2625_s21 + $0x1e8] sm:$0xff] %v1338_v40 }
 0x265   : > { %1371 = vst [vmem:[%s2625_s21 + $0xf0] sm:$0xff] %v1307_v5  ;;  %1372 = vst [vmem:[%s2625_s21 + $0xf8] sm:$0xff] %v1308_v51  ;;  %v1276_v23 = vmul.f32 %v1827_v31, %v1244_v22 }
 0x267   : > { %v1339_v33 = vmul.f32 %v3011_v9, %v1276_v23  ;;  %v1340_v21 = vmul.f32 %v3012_v45, %v1276_v23 }
 0x269   : > { %1403 = vst [vmem:[%s2625_s21 + $0x1f0] sm:$0xff] %v1339_v33  ;;  %1404 = vst [vmem:[%s2625_s21 + $0x1f8] sm:$0xff] %v1340_v21 }
 0x26a   : > { %1841 = shalt.err (!%p1838_p5)
}
 0x26b   : > { %s1842_s7 = scalar_lea.hbm %s2841_s29, 8192  ;;  %s1846_s10 = scalar_lea.hbm %s2899_s3, 16384 }
 0x26c   : > { %p1843_p6 = scmp.ne.s32.totalorder %s2841_s29, %s1842_s7  ;;  %p1847_p10 = scmp.lt.s32.totalorder %s2841_s29, %s2899_s3 }
 0x26d   : > { %p1848_p11 = scmp.lt.s32.totalorder %s1846_s10, %s1842_s7 }
 0x26e   : > { %p1844_p7 = pnand %p1843_p6, %p1970_p4 }
 0x26f   : > { %p1849_p12 = por %p1848_p11, %p1847_p10 }
 0x270   : > { %p1845_p9 = pneg %p1844_p7 }
 0x272   : > { %p1850_p13 = pnand %p1849_p12, %p1845_p9 }
 0x274   : > { %1853 = shalt.err (!%p1850_p13)
}
 0x275   : > { %s1908_s19 = smov 256   ;;  %s1909_s21 = smov 16  }
 0x276   : > { %1578 = dma.vmem_to_hbm [thread:$0]  (%p1970_p4), %s2843_s26, 8192, %s2841_s29, %s2851_s15, %s1908_s19, %s1908_s19, %s1909_s21  }
 0x277 PF: > { %p1584_p0 = scmp.ge.s32.totalorder %s1904_s17, 2  ;;  %s1437_s23 = sand.u32 1, %s1884_s12  }
 0x278   : > { %s1438_s27 = scalar_lea.sflag [#allocation3], %s1437_s23 }
 0x279   : > { %p1581_p1 = pnand %p1584_p0, %p1977_p8 }
 0x27b   : > { %p1582_p2 = pneg %p1581_p1 }
 0x27d   : > { %1879 = dma.done.wait (%p1582_p2), %s1438_s27, 8192  }
 0x27e   : > { %1881 = vsyncadd (%p1582_p2), %s1438_s27, 4294959104  ;;  %s16_s17 = sadd.s32 1, %s1904_s17   ;;  %s3013_s12 = smov %s1888_s13 }
 0x27f   : > { %p13_p3 = scmp.ge.s32.totalorder %s16_s17, 4   ;;  %s3014_s13 = smov %s1892_s14 }
 0x280   : > { %s3015_s14 = smov %s1983_s25  ;;  %s3016_s15 = smov %s1900_s16 }
 0x281   : > { %s3017_s16 = smov %s3019_s20  ;;  %15 = sbr.rel (!%p13_p3) target bundleno = 4 (0x4), region = 73 }
 0x286   :  { %1443 = vsyncpa [#allocation3], 1 }
 0x287   :  { %1445 = vsyncpa [#allocation3 + $0x1], 1 }

</bundles_post_ra>
